<compile_context>
chip_gen: v7x
topology: tpu7x:2x2x1
jax: 0.10.0
libtpu: 0.0.40
codegen_flags: <defaults>
</compile_context>

<pallas_src>
import functools

import jax
import jax.numpy as jnp
from jax import lax
from jax.experimental import pallas as pl
from jax.experimental.pallas import tpu as pltpu

IOU_THRESHOLD = 0.5
_BLK = 8  # sublane block for the clique-formation loop


def _roi_merge_kernel(j_ref, cd_ref, mcd_ref, stats_ref, *, n_valid):
    """All inputs are already sorted by score (descending) and row-padded to a
    multiple of 8.

    j_ref   : (N, N)  IoU matrix (sorted both ways).  Overwritten in place with
              the clique-membership matrix M (row h == clique headed by ROI h).
    cd_ref  : (N, 2K) concat([C, D], axis=1), sorted.
    mcd_ref : (N, 2K) merged outputs (sorted frame).
    stats_ref : (1, 128) f32; lanes 0/1/2 = num_heads / max_clique / min_clique.
    n_valid : number of real (non-padded) ROIs (static).
    """
    N = j_ref.shape[0]
    idx = lax.broadcasted_iota(jnp.int32, (1, N), 1)  # lane index 0..N-1
    valid = (idx < n_valid) if n_valid < N else None

    # --- greedy NMS-style clique formation, blocked by 8 sublane rows ---
    def block_body(b, assigned):
        i0 = pl.multiple_of(b * _BLK, _BLK)
        jblk = j_ref[pl.ds(i0, _BLK), :]                       # (8, N) aligned load
        rows = []
        for r in range(_BLK):                                  # static unroll
            i = i0 + r
            jrow = jblk[r:r + 1, :]                            # (1, N)
            is_i = idx == i
            cond = ((jrow >= IOU_THRESHOLD) | is_i) & (assigned < 0.5) & (idx >= i)
            if valid is not None:
                cond = cond & valid
            members = jnp.where(cond, 1.0, 0.0)                # (1, N)
            # 1.0 iff ROI i itself is still free (and a real ROI) -> gate the row.
            not_assigned_i = jnp.max(jnp.where(is_i, members, 0.0))
            members = members * not_assigned_i
            rows.append(members)
            assigned = jnp.maximum(assigned, members)
        # Row block i0..i0+7 of J is dead now -> reuse j_ref as the membership
        # matrix M with a single aligned (8, N) store.
        j_ref[pl.ds(i0, _BLK), :] = jnp.concatenate(rows, axis=0)
        return assigned

    lax.fori_loop(0, N // _BLK, block_body, jnp.zeros((1, N), jnp.float32))

    # --- clique averaging on the MXU (j_ref now holds M) ---
    M = j_ref[...]                                             # (N, N) membership
    cnt = jnp.sum(M, axis=1, keepdims=True)                    # (N, 1) clique sizes
    inv_cnt = jnp.where(cnt > 0.0, 1.0 / jnp.maximum(cnt, 1.0), 0.0)

    avg = jnp.dot(M, cd_ref[...], preferred_element_type=jnp.float32) * inv_cnt
    # Scatter head-averages back to every clique member: MCD = M^T @ avg
    mcd_ref[...] = lax.dot_general(
        M, avg, (((0,), (0,)), ((), ())),
        preferred_element_type=jnp.float32).astype(mcd_ref.dtype)

    # --- clique statistics (XLU reductions; avoid shipping cnt back) ---
    num_heads = jnp.sum(jnp.where(cnt > 0.0, 1.0, 0.0))
    max_clique = jnp.max(cnt)
    min_clique = jnp.min(jnp.where(cnt > 0.0, cnt, 1e9))       # finite sentinel
    lane = lax.broadcasted_iota(jnp.int32, (1, 128), 1)
    stats_ref[...] = (num_heads * (lane == 0).astype(jnp.float32)
                      + max_clique * (lane == 1).astype(jnp.float32)
                      + min_clique * (lane == 2).astype(jnp.float32))


def _roi_merge_pallas(Js, CDs, n_valid):
    N, K2 = CDs.shape
    # J (double-buffered) + CD in/out (double-buffered) + slack.
    vmem_needed = 2 * N * N * 4 + 4 * N * K2 * 4 + (2 << 20)
    vmem_limit = int(min(max(vmem_needed, 8 << 20), 48 << 20))

    out_shape = (
        jax.ShapeDtypeStruct((N, K2), jnp.float32),
        jax.ShapeDtypeStruct((1, 128), jnp.float32),
    )
    return pl.pallas_call(
        functools.partial(_roi_merge_kernel, n_valid=n_valid),
        out_shape=out_shape,
        grid=(1,),
        in_specs=[
            pl.BlockSpec((N, N), lambda i: (0, 0)),
            pl.BlockSpec((N, K2), lambda i: (0, 0)),
        ],
        out_specs=(
            pl.BlockSpec((N, K2), lambda i: (0, 0)),
            pl.BlockSpec((1, 128), lambda i: (0, 0)),
        ),
        compiler_params=pltpu.CompilerParams(
            dimension_semantics=("arbitrary",),
            vmem_limit_bytes=vmem_limit),
    )(Js, CDs)


def roi_merge_forward(S, J, C, D, P):
    """Equivalent of _C.roi_merge_forward (forward only): returns (MC, MD, P_new)."""
    N = S.shape[0]
    K = C.shape[1]

    order = jnp.argsort(-S)                 # descending score order (stable)
    inv_order = jnp.argsort(order)

    Js = J[order][:, order].astype(jnp.float32)
    CDs = jnp.concatenate(
        [C[order].astype(jnp.float32), D[order].astype(jnp.float32)], axis=1)

    # Pad the ROI dimension to a multiple of 8 for the blocked clique loop.
    n_pad = (-N) % _BLK
    if n_pad:
        Js = jnp.pad(Js, ((0, n_pad), (0, n_pad)))
        CDs = jnp.pad(CDs, ((0, n_pad), (0, 0)))

    MCDs, stats = _roi_merge_pallas(Js, CDs, n_valid=N)

    MCDs = MCDs[:N]
    MC = MCDs[:, :K].astype(C.dtype)[inv_order]
    MD = MCDs[:, K:].astype(D.dtype)[inv_order]

    num_heads = stats[0, 0].astype(jnp.int32)
    max_clique = stats[0, 1].astype(jnp.int32)
    min_clique = stats[0, 2].astype(jnp.int32)

    # P layout: [debug_info, display, cur_iter, max_epoch, size_epoch,
    #            acc_num_top_id, acc_max_clique, acc_min_clique]
    P_new = (P.at[2].add(1)
              .at[5].add(num_heads)
              .at[6].add(max_clique)
              .at[7].add(min_clique))
    return MC, MD, P_new


class ROIMerge:
    """JAX counterpart of wsl.layers.roi_merge.ROIMerge (forward only)."""

    def __init__(self, debug_info, display, max_epoch, size_epoch):
        P = jnp.zeros((8,), dtype=jnp.int32)
        P = (P.at[0].set(debug_info)
              .at[1].set(display)
              .at[3].set(max_epoch)
              .at[4].set(size_epoch))
        self.P = P

    def __call__(self, S, J, C, D):
        MC, MD, P_new = roi_merge_forward(S, J, C, D, self.P)
        self.P = P_new
        return MC, MD

    def __repr__(self):
        P = jax.device_get(self.P)
        return (f"ROIMerge(debug_info={P[0]} display={P[1]} cur_iter={P[2]} "
                f"max_epoch={P[3]} size_epoch={P[4]} acc_num_top_id={P[5]} "
                f"acc_max_clique={P[6]} acc_min_clique={P[7]})")


if __name__ == "__main__":
    key = jax.random.PRNGKey(0)
    k_s, k_j, k_c, k_d = jax.random.split(key, 4)

    N, K = 128, 16  # ROIs, classes

    # Scores, a symmetric IoU-like matrix with unit diagonal, class/det scores.
    S = jax.random.uniform(k_s, (N,), dtype=jnp.float32)
    J = jax.random.uniform(k_j, (N, N), dtype=jnp.float32)
    J = 0.5 * (J + J.T)
    J = J.at[jnp.arange(N), jnp.arange(N)].set(1.0)
    C = jax.random.normal(k_c, (N, K), dtype=jnp.float32)
    D = jax.random.normal(k_d, (N, K), dtype=jnp.float32)

    module = ROIMerge(debug_info=0, display=20, max_epoch=20, size_epoch=5000)
    MC, MD = module(S, J, C, D)
    jax.block_until_ready((MC, MD, module.P))

    assert MC.shape == (N, K) and MD.shape == (N, K)
    assert MC.dtype == C.dtype and MD.dtype == D.dtype
    assert int(module.P[2]) == 1   # cur_iter incremented
    assert int(module.P[5]) >= 1   # at least one clique head
    assert int(module.P[6]) >= int(module.P[7]) >= 1

    print("KERNEL_OK")
</pallas_src>

<mosaic_0001>
module attributes {stable_mosaic.version = 11 : i64} {
  func.func @_roi_merge_kernel(%arg0: i32, %arg1: memref<128x128xf32, #tpu.memory_space<vmem>>, %arg2: memref<128x32xf32, #tpu.memory_space<vmem>>, %arg3: memref<128x32xf32, #tpu.memory_space<vmem>>, %arg4: memref<1x128xf32, #tpu.memory_space<vmem>>) attributes {dimension_semantics = [#tpu.dimension_semantics<arbitrary>], iteration_bounds = array<i64: 1>, scalar_prefetch = 0 : i64, scratch_operands = 0 : i64, tpu.core_type = #tpu.core_type<tc>, window_params = [{pipeline_mode = #tpu.pipeline_mode<synchronous>, transform_indices = @transform_0, window_bounds = array<i64: 128, 128>}, {pipeline_mode = #tpu.pipeline_mode<synchronous>, transform_indices = @transform_1, window_bounds = array<i64: 128, 32>}, {pipeline_mode = #tpu.pipeline_mode<synchronous>, transform_indices = @transform_2, window_bounds = array<i64: 128, 32>}, {pipeline_mode = #tpu.pipeline_mode<synchronous>, transform_indices = @transform_3, window_bounds = array<i64: 1, 128>}]} {
    %0 = tpu.iota {dimensions = array<i32: 1>} : vector<1x128xi32>
    %cst = arith.constant 0.000000e+00 : f32
    %1 = vector.broadcast %cst : f32 to vector<1x128xf32>
    %c0_i32 = arith.constant 0 : i32
    %c16_i32 = arith.constant 16 : i32
    %2 = arith.addi %c0_i32, %c16_i32 : i32
    %c1_i32 = arith.constant 1 : i32
    %3 = scf.for %arg5 = %c0_i32 to %2 step %c1_i32 iter_args(%arg6 = %1) -> (vector<1x128xf32>)  : i32 {
      %c8_i32 = arith.constant 8 : i32
      %64 = arith.muli %arg5, %c8_i32 : i32
      %65 = tpu.assume_multiple %64, 8 : i32
      %66 = arith.index_cast %65 : i32 to index
      %c0_25 = arith.constant 0 : index
      %67 = vector.load %arg1[%66, %c0_25] : memref<128x128xf32, #tpu.memory_space<vmem>>, vector<8x128xf32>
      %c0_i32_26 = arith.constant 0 : i32
      %68 = arith.addi %65, %c0_i32_26 : i32
      %69 = vector.extract_strided_slice %67 {offsets = [0, 0], sizes = [1, 128], strides = [1, 1]} : vector<8x128xf32> to vector<1x128xf32>
      %70 = vector.broadcast %68 : i32 to vector<1x128xi32>
      %71 = arith.cmpi eq, %0, %70 : vector<1x128xi32>
      %cst_27 = arith.constant 5.000000e-01 : f32
      %72 = vector.broadcast %cst_27 : f32 to vector<1x128xf32>
      %73 = arith.cmpf oge, %69, %72 : vector<1x128xf32>
      %74 = arith.ori %73, %71 : vector<1x128xi1>
      %cst_28 = arith.constant 5.000000e-01 : f32
      %75 = vector.broadcast %cst_28 : f32 to vector<1x128xf32>
      %76 = arith.cmpf olt, %arg6, %75 : vector<1x128xf32>
      %77 = arith.andi %74, %76 : vector<1x128xi1>
      %78 = vector.broadcast %68 : i32 to vector<1x128xi32>
      %79 = arith.cmpi sge, %0, %78 : vector<1x128xi32>
      %80 = arith.andi %77, %79 : vector<1x128xi1>
      %cst_29 = arith.constant 1.000000e+00 : f32
      %cst_30 = arith.constant 0.000000e+00 : f32
      %81 = vector.broadcast %cst_29 : f32 to vector<1x128xf32>
      %82 = vector.broadcast %cst_30 : f32 to vector<1x128xf32>
      %83 = arith.select %80, %81, %82 : vector<1x128xi1>, vector<1x128xf32>
      %cst_31 = arith.constant 0.000000e+00 : f32
      %84 = vector.broadcast %cst_31 : f32 to vector<1x128xf32>
      %85 = arith.select %71, %83, %84 : vector<1x128xi1>, vector<1x128xf32>
      %86 = vector.shape_cast %85 : vector<1x128xf32> to vector<1x1x128xf32>
      %cst_32 = arith.constant dense<0xFF800000> : vector<1xf32>
      %87 = vector.multi_reduction <maximumf>, %86, %cst_32 [1, 2] : vector<1x1x128xf32> to vector<1xf32>
      %88 = vector.shape_cast %87 : vector<1xf32> to vector<1x1x1xf32>
      %89 = vector.extract %88[0, 0, 0] : f32 from vector<1x1x1xf32>
      %90 = vector.broadcast %89 : f32 to vector<1x128xf32>
      %91 = arith.mulf %83, %90 : vector<1x128xf32>
      %92 = arith.maximumf %arg6, %91 : vector<1x128xf32>
      %c1_i32_33 = arith.constant 1 : i32
      %93 = arith.addi %65, %c1_i32_33 : i32
      %94 = vector.extract_strided_slice %67 {offsets = [1, 0], sizes = [1, 128], strides = [1, 1]} : vector<8x128xf32> to vector<1x128xf32>
      %95 = vector.broadcast %93 : i32 to vector<1x128xi32>
      %96 = arith.cmpi eq, %0, %95 : vector<1x128xi32>
      %cst_34 = arith.constant 5.000000e-01 : f32
      %97 = vector.broadcast %cst_34 : f32 to vector<1x128xf32>
      %98 = arith.cmpf oge, %94, %97 : vector<1x128xf32>
      %99 = arith.ori %98, %96 : vector<1x128xi1>
      %cst_35 = arith.constant 5.000000e-01 : f32
      %100 = vector.broadcast %cst_35 : f32 to vector<1x128xf32>
      %101 = arith.cmpf olt, %92, %100 : vector<1x128xf32>
      %102 = arith.andi %99, %101 : vector<1x128xi1>
      %103 = vector.broadcast %93 : i32 to vector<1x128xi32>
      %104 = arith.cmpi sge, %0, %103 : vector<1x128xi32>
      %105 = arith.andi %102, %104 : vector<1x128xi1>
      %cst_36 = arith.constant 1.000000e+00 : f32
      %cst_37 = arith.constant 0.000000e+00 : f32
      %106 = vector.broadcast %cst_36 : f32 to vector<1x128xf32>
      %107 = vector.broadcast %cst_37 : f32 to vector<1x128xf32>
      %108 = arith.select %105, %106, %107 : vector<1x128xi1>, vector<1x128xf32>
      %cst_38 = arith.constant 0.000000e+00 : f32
      %109 = vector.broadcast %cst_38 : f32 to vector<1x128xf32>
      %110 = arith.select %96, %108, %109 : vector<1x128xi1>, vector<1x128xf32>
      %111 = vector.shape_cast %110 : vector<1x128xf32> to vector<1x1x128xf32>
      %cst_39 = arith.constant dense<0xFF800000> : vector<1xf32>
      %112 = vector.multi_reduction <maximumf>, %111, %cst_39 [1, 2] : vector<1x1x128xf32> to vector<1xf32>
      %113 = vector.shape_cast %112 : vector<1xf32> to vector<1x1x1xf32>
      %114 = vector.extract %113[0, 0, 0] : f32 from vector<1x1x1xf32>
      %115 = vector.broadcast %114 : f32 to vector<1x128xf32>
      %116 = arith.mulf %108, %115 : vector<1x128xf32>
      %117 = arith.maximumf %92, %116 : vector<1x128xf32>
      %c2_i32_40 = arith.constant 2 : i32
      %118 = arith.addi %65, %c2_i32_40 : i32
      %119 = vector.extract_strided_slice %67 {offsets = [2, 0], sizes = [1, 128], strides = [1, 1]} : vector<8x128xf32> to vector<1x128xf32>
      %120 = vector.broadcast %118 : i32 to vector<1x128xi32>
      %121 = arith.cmpi eq, %0, %120 : vector<1x128xi32>
      %cst_41 = arith.constant 5.000000e-01 : f32
      %122 = vector.broadcast %cst_41 : f32 to vector<1x128xf32>
      %123 = arith.cmpf oge, %119, %122 : vector<1x128xf32>
      %124 = arith.ori %123, %121 : vector<1x128xi1>
      %cst_42 = arith.constant 5.000000e-01 : f32
      %125 = vector.broadcast %cst_42 : f32 to vector<1x128xf32>
      %126 = arith.cmpf olt, %117, %125 : vector<1x128xf32>
      %127 = arith.andi %124, %126 : vector<1x128xi1>
      %128 = vector.broadcast %118 : i32 to vector<1x128xi32>
      %129 = arith.cmpi sge, %0, %128 : vector<1x128xi32>
      %130 = arith.andi %127, %129 : vector<1x128xi1>
      %cst_43 = arith.constant 1.000000e+00 : f32
      %cst_44 = arith.constant 0.000000e+00 : f32
      %131 = vector.broadcast %cst_43 : f32 to vector<1x128xf32>
      %132 = vector.broadcast %cst_44 : f32 to vector<1x128xf32>
      %133 = arith.select %130, %131, %132 : vector<1x128xi1>, vector<1x128xf32>
      %cst_45 = arith.constant 0.000000e+00 : f32
      %134 = vector.broadcast %cst_45 : f32 to vector<1x128xf32>
      %135 = arith.select %121, %133, %134 : vector<1x128xi1>, vector<1x128xf32>
      %136 = vector.shape_cast %135 : vector<1x128xf32> to vector<1x1x128xf32>
      %cst_46 = arith.constant dense<0xFF800000> : vector<1xf32>
      %137 = vector.multi_reduction <maximumf>, %136, %cst_46 [1, 2] : vector<1x1x128xf32> to vector<1xf32>
      %138 = vector.shape_cast %137 : vector<1xf32> to vector<1x1x1xf32>
      %139 = vector.extract %138[0, 0, 0] : f32 from vector<1x1x1xf32>
      %140 = vector.broadcast %139 : f32 to vector<1x128xf32>
      %141 = arith.mulf %133, %140 : vector<1x128xf32>
      %142 = arith.maximumf %117, %141 : vector<1x128xf32>
      %c3_i32 = arith.constant 3 : i32
      %143 = arith.addi %65, %c3_i32 : i32
      %144 = vector.extract_strided_slice %67 {offsets = [3, 0], sizes = [1, 128], strides = [1, 1]} : vector<8x128xf32> to vector<1x128xf32>
      %145 = vector.broadcast %143 : i32 to vector<1x128xi32>
      %146 = arith.cmpi eq, %0, %145 : vector<1x128xi32>
      %cst_47 = arith.constant 5.000000e-01 : f32
      %147 = vector.broadcast %cst_47 : f32 to vector<1x128xf32>
      %148 = arith.cmpf oge, %144, %147 : vector<1x128xf32>
      %149 = arith.ori %148, %146 : vector<1x128xi1>
      %cst_48 = arith.constant 5.000000e-01 : f32
      %150 = vector.broadcast %cst_48 : f32 to vector<1x128xf32>
      %151 = arith.cmpf olt, %142, %150 : vector<1x128xf32>
      %152 = arith.andi %149, %151 : vector<1x128xi1>
      %153 = vector.broadcast %143 : i32 to vector<1x128xi32>
      %154 = arith.cmpi sge, %0, %153 : vector<1x128xi32>
      %155 = arith.andi %152, %154 : vector<1x128xi1>
      %cst_49 = arith.constant 1.000000e+00 : f32
      %cst_50 = arith.constant 0.000000e+00 : f32
      %156 = vector.broadcast %cst_49 : f32 to vector<1x128xf32>
      %157 = vector.broadcast %cst_50 : f32 to vector<1x128xf32>
      %158 = arith.select %155, %156, %157 : vector<1x128xi1>, vector<1x128xf32>
      %cst_51 = arith.constant 0.000000e+00 : f32
      %159 = vector.broadcast %cst_51 : f32 to vector<1x128xf32>
      %160 = arith.select %146, %158, %159 : vector<1x128xi1>, vector<1x128xf32>
      %161 = vector.shape_cast %160 : vector<1x128xf32> to vector<1x1x128xf32>
      %cst_52 = arith.constant dense<0xFF800000> : vector<1xf32>
      %162 = vector.multi_reduction <maximumf>, %161, %cst_52 [1, 2] : vector<1x1x128xf32> to vector<1xf32>
      %163 = vector.shape_cast %162 : vector<1xf32> to vector<1x1x1xf32>
      %164 = vector.extract %163[0, 0, 0] : f32 from vector<1x1x1xf32>
      %165 = vector.broadcast %164 : f32 to vector<1x128xf32>
      %166 = arith.mulf %158, %165 : vector<1x128xf32>
      %167 = arith.maximumf %142, %166 : vector<1x128xf32>
      %c4_i32 = arith.constant 4 : i32
      %168 = arith.addi %65, %c4_i32 : i32
      %169 = vector.extract_strided_slice %67 {offsets = [4, 0], sizes = [1, 128], strides = [1, 1]} : vector<8x128xf32> to vector<1x128xf32>
      %170 = vector.broadcast %168 : i32 to vector<1x128xi32>
      %171 = arith.cmpi eq, %0, %170 : vector<1x128xi32>
      %cst_53 = arith.constant 5.000000e-01 : f32
      %172 = vector.broadcast %cst_53 : f32 to vector<1x128xf32>
      %173 = arith.cmpf oge, %169, %172 : vector<1x128xf32>
      %174 = arith.ori %173, %171 : vector<1x128xi1>
      %cst_54 = arith.constant 5.000000e-01 : f32
      %175 = vector.broadcast %cst_54 : f32 to vector<1x128xf32>
      %176 = arith.cmpf olt, %167, %175 : vector<1x128xf32>
      %177 = arith.andi %174, %176 : vector<1x128xi1>
      %178 = vector.broadcast %168 : i32 to vector<1x128xi32>
      %179 = arith.cmpi sge, %0, %178 : vector<1x128xi32>
      %180 = arith.andi %177, %179 : vector<1x128xi1>
      %cst_55 = arith.constant 1.000000e+00 : f32
      %cst_56 = arith.constant 0.000000e+00 : f32
      %181 = vector.broadcast %cst_55 : f32 to vector<1x128xf32>
      %182 = vector.broadcast %cst_56 : f32 to vector<1x128xf32>
      %183 = arith.select %180, %181, %182 : vector<1x128xi1>, vector<1x128xf32>
      %cst_57 = arith.constant 0.000000e+00 : f32
      %184 = vector.broadcast %cst_57 : f32 to vector<1x128xf32>
      %185 = arith.select %171, %183, %184 : vector<1x128xi1>, vector<1x128xf32>
      %186 = vector.shape_cast %185 : vector<1x128xf32> to vector<1x1x128xf32>
      %cst_58 = arith.constant dense<0xFF800000> : vector<1xf32>
      %187 = vector.multi_reduction <maximumf>, %186, %cst_58 [1, 2] : vector<1x1x128xf32> to vector<1xf32>
      %188 = vector.shape_cast %187 : vector<1xf32> to vector<1x1x1xf32>
      %189 = vector.extract %188[0, 0, 0] : f32 from vector<1x1x1xf32>
      %190 = vector.broadcast %189 : f32 to vector<1x128xf32>
      %191 = arith.mulf %183, %190 : vector<1x128xf32>
      %192 = arith.maximumf %167, %191 : vector<1x128xf32>
      %c5_i32 = arith.constant 5 : i32
      %193 = arith.addi %65, %c5_i32 : i32
      %194 = vector.extract_strided_slice %67 {offsets = [5, 0], sizes = [1, 128], strides = [1, 1]} : vector<8x128xf32> to vector<1x128xf32>
      %195 = vector.broadcast %193 : i32 to vector<1x128xi32>
      %196 = arith.cmpi eq, %0, %195 : vector<1x128xi32>
      %cst_59 = arith.constant 5.000000e-01 : f32
      %197 = vector.broadcast %cst_59 : f32 to vector<1x128xf32>
      %198 = arith.cmpf oge, %194, %197 : vector<1x128xf32>
      %199 = arith.ori %198, %196 : vector<1x128xi1>
      %cst_60 = arith.constant 5.000000e-01 : f32
      %200 = vector.broadcast %cst_60 : f32 to vector<1x128xf32>
      %201 = arith.cmpf olt, %192, %200 : vector<1x128xf32>
      %202 = arith.andi %199, %201 : vector<1x128xi1>
      %203 = vector.broadcast %193 : i32 to vector<1x128xi32>
      %204 = arith.cmpi sge, %0, %203 : vector<1x128xi32>
      %205 = arith.andi %202, %204 : vector<1x128xi1>
      %cst_61 = arith.constant 1.000000e+00 : f32
      %cst_62 = arith.constant 0.000000e+00 : f32
      %206 = vector.broadcast %cst_61 : f32 to vector<1x128xf32>
      %207 = vector.broadcast %cst_62 : f32 to vector<1x128xf32>
      %208 = arith.select %205, %206, %207 : vector<1x128xi1>, vector<1x128xf32>
      %cst_63 = arith.constant 0.000000e+00 : f32
      %209 = vector.broadcast %cst_63 : f32 to vector<1x128xf32>
      %210 = arith.select %196, %208, %209 : vector<1x128xi1>, vector<1x128xf32>
      %211 = vector.shape_cast %210 : vector<1x128xf32> to vector<1x1x128xf32>
      %cst_64 = arith.constant dense<0xFF800000> : vector<1xf32>
      %212 = vector.multi_reduction <maximumf>, %211, %cst_64 [1, 2] : vector<1x1x128xf32> to vector<1xf32>
      %213 = vector.shape_cast %212 : vector<1xf32> to vector<1x1x1xf32>
      %214 = vector.extract %213[0, 0, 0] : f32 from vector<1x1x1xf32>
      %215 = vector.broadcast %214 : f32 to vector<1x128xf32>
      %216 = arith.mulf %208, %215 : vector<1x128xf32>
      %217 = arith.maximumf %192, %216 : vector<1x128xf32>
      %c6_i32 = arith.constant 6 : i32
      %218 = arith.addi %65, %c6_i32 : i32
      %219 = vector.extract_strided_slice %67 {offsets = [6, 0], sizes = [1, 128], strides = [1, 1]} : vector<8x128xf32> to vector<1x128xf32>
      %220 = vector.broadcast %218 : i32 to vector<1x128xi32>
      %221 = arith.cmpi eq, %0, %220 : vector<1x128xi32>
      %cst_65 = arith.constant 5.000000e-01 : f32
      %222 = vector.broadcast %cst_65 : f32 to vector<1x128xf32>
      %223 = arith.cmpf oge, %219, %222 : vector<1x128xf32>
      %224 = arith.ori %223, %221 : vector<1x128xi1>
      %cst_66 = arith.constant 5.000000e-01 : f32
      %225 = vector.broadcast %cst_66 : f32 to vector<1x128xf32>
      %226 = arith.cmpf olt, %217, %225 : vector<1x128xf32>
      %227 = arith.andi %224, %226 : vector<1x128xi1>
      %228 = vector.broadcast %218 : i32 to vector<1x128xi32>
      %229 = arith.cmpi sge, %0, %228 : vector<1x128xi32>
      %230 = arith.andi %227, %229 : vector<1x128xi1>
      %cst_67 = arith.constant 1.000000e+00 : f32
      %cst_68 = arith.constant 0.000000e+00 : f32
      %231 = vector.broadcast %cst_67 : f32 to vector<1x128xf32>
      %232 = vector.broadcast %cst_68 : f32 to vector<1x128xf32>
      %233 = arith.select %230, %231, %232 : vector<1x128xi1>, vector<1x128xf32>
      %cst_69 = arith.constant 0.000000e+00 : f32
      %234 = vector.broadcast %cst_69 : f32 to vector<1x128xf32>
      %235 = arith.select %221, %233, %234 : vector<1x128xi1>, vector<1x128xf32>
      %236 = vector.shape_cast %235 : vector<1x128xf32> to vector<1x1x128xf32>
      %cst_70 = arith.constant dense<0xFF800000> : vector<1xf32>
      %237 = vector.multi_reduction <maximumf>, %236, %cst_70 [1, 2] : vector<1x1x128xf32> to vector<1xf32>
      %238 = vector.shape_cast %237 : vector<1xf32> to vector<1x1x1xf32>
      %239 = vector.extract %238[0, 0, 0] : f32 from vector<1x1x1xf32>
      %240 = vector.broadcast %239 : f32 to vector<1x128xf32>
      %241 = arith.mulf %233, %240 : vector<1x128xf32>
      %242 = arith.maximumf %217, %241 : vector<1x128xf32>
      %c7_i32 = arith.constant 7 : i32
      %243 = arith.addi %65, %c7_i32 : i32
      %244 = vector.extract_strided_slice %67 {offsets = [7, 0], sizes = [1, 128], strides = [1, 1]} : vector<8x128xf32> to vector<1x128xf32>
      %245 = vector.broadcast %243 : i32 to vector<1x128xi32>
      %246 = arith.cmpi eq, %0, %245 : vector<1x128xi32>
      %cst_71 = arith.constant 5.000000e-01 : f32
      %247 = vector.broadcast %cst_71 : f32 to vector<1x128xf32>
      %248 = arith.cmpf oge, %244, %247 : vector<1x128xf32>
      %249 = arith.ori %248, %246 : vector<1x128xi1>
      %cst_72 = arith.constant 5.000000e-01 : f32
      %250 = vector.broadcast %cst_72 : f32 to vector<1x128xf32>
      %251 = arith.cmpf olt, %242, %250 : vector<1x128xf32>
      %252 = arith.andi %249, %251 : vector<1x128xi1>
      %253 = vector.broadcast %243 : i32 to vector<1x128xi32>
      %254 = arith.cmpi sge, %0, %253 : vector<1x128xi32>
      %255 = arith.andi %252, %254 : vector<1x128xi1>
      %cst_73 = arith.constant 1.000000e+00 : f32
      %cst_74 = arith.constant 0.000000e+00 : f32
      %256 = vector.broadcast %cst_73 : f32 to vector<1x128xf32>
      %257 = vector.broadcast %cst_74 : f32 to vector<1x128xf32>
      %258 = arith.select %255, %256, %257 : vector<1x128xi1>, vector<1x128xf32>
      %cst_75 = arith.constant 0.000000e+00 : f32
      %259 = vector.broadcast %cst_75 : f32 to vector<1x128xf32>
      %260 = arith.select %246, %258, %259 : vector<1x128xi1>, vector<1x128xf32>
      %261 = vector.shape_cast %260 : vector<1x128xf32> to vector<1x1x128xf32>
      %cst_76 = arith.constant dense<0xFF800000> : vector<1xf32>
      %262 = vector.multi_reduction <maximumf>, %261, %cst_76 [1, 2] : vector<1x1x128xf32> to vector<1xf32>
      %263 = vector.shape_cast %262 : vector<1xf32> to vector<1x1x1xf32>
      %264 = vector.extract %263[0, 0, 0] : f32 from vector<1x1x1xf32>
      %265 = vector.broadcast %264 : f32 to vector<1x128xf32>
      %266 = arith.mulf %258, %265 : vector<1x128xf32>
      %267 = arith.maximumf %242, %266 : vector<1x128xf32>
      %268 = tpu.concatenate %91, %116, %141, %166, %191, %216, %241, %266 in 0 : vector<1x128xf32>, vector<1x128xf32>, vector<1x128xf32>, vector<1x128xf32>, vector<1x128xf32>, vector<1x128xf32>, vector<1x128xf32>, vector<1x128xf32> -> vector<8x128xf32>
      %269 = arith.index_cast %65 : i32 to index
      %c0_77 = arith.constant 0 : index
      %270 = vector.load %arg1[%269, %c0_77] : memref<128x128xf32, #tpu.memory_space<vmem>>, vector<8x128xf32>
      tpu.vector_store %arg1[%269, %c0_77], %268 {strides = array<i32>} : memref<128x128xf32, #tpu.memory_space<vmem>>, vector<8x128xf32>,
      scf.yield %267 : vector<1x128xf32>
    }
    %c16_i32_0 = arith.constant 16 : i32
    %c0 = arith.constant 0 : index
    %c0_1 = arith.constant 0 : index
    %4 = vector.load %arg1[%c0, %c0_1] : memref<128x128xf32, #tpu.memory_space<vmem>>, vector<128x128xf32>
    %cst_2 = arith.constant dense<0.000000e+00> : vector<128xf32>
    %5 = vector.multi_reduction <add>, %4, %cst_2 [1] : vector<128x128xf32> to vector<128xf32>
    %6 = vector.shape_cast %5 : vector<128xf32> to vector<128x1xf32>
    %cst_3 = arith.constant 0.000000e+00 : f32
    %7 = vector.broadcast %cst_3 : f32 to vector<128x1xf32>
    %8 = arith.cmpf ogt, %6, %7 : vector<128x1xf32>
    %cst_4 = arith.constant 1.000000e+00 : f32
    %9 = vector.broadcast %cst_4 : f32 to vector<128x1xf32>
    %10 = arith.maximumf %6, %9 : vector<128x1xf32>
    %cst_5 = arith.constant 1.000000e+00 : f32
    %11 = vector.broadcast %cst_5 : f32 to vector<128x1xf32>
    %12 = arith.divf %11, %10 : vector<128x1xf32>
    %cst_6 = arith.constant 0.000000e+00 : f32
    %13 = vector.broadcast %cst_6 : f32 to vector<128x1xf32>
    %14 = arith.select %8, %12, %13 : vector<128x1xi1>, vector<128x1xf32>
    %c0_7 = arith.constant 0 : index
    %c0_8 = arith.constant 0 : index
    %15 = vector.load %arg2[%c0_7, %c0_8] : memref<128x32xf32, #tpu.memory_space<vmem>>, vector<128x32xf32>
    %cst_9 = arith.constant dense<0.000000e+00> : vector<128x32xf32>
    %16 = tpu.matmul %4, %15, %cst_9 {dimension_numbers = #tpu.dot_dimension_numbers<[1], [0], [0], [1], [0, 0, 1, 1], [], []>} : vector<128x128xf32>, vector<128x32xf32>, vector<128x32xf32> -> vector<128x32xf32>
    %17 = vector.broadcast %14 : vector<128x1xf32> to vector<128x32xf32>
    %18 = arith.mulf %16, %17 : vector<128x32xf32>
    %cst_10 = arith.constant dense<0.000000e+00> : vector<128x32xf32>
    %19 = tpu.matmul %4, %18, %cst_10 {dimension_numbers = #tpu.dot_dimension_numbers<[0], [0], [1], [1], [0, 1, 1, 1], [], []>} : vector<128x128xf32>, vector<128x32xf32>, vector<128x32xf32> -> vector<128x32xf32>
    %c0_11 = arith.constant 0 : index
    %c0_12 = arith.constant 0 : index
    %20 = vector.load %arg3[%c0_11, %c0_12] : memref<128x32xf32, #tpu.memory_space<vmem>>, vector<128x32xf32>
    tpu.vector_store %arg3[%c0_11, %c0_12], %19 {strides = array<i32>} : memref<128x32xf32, #tpu.memory_space<vmem>>, vector<128x32xf32>,
    %cst_13 = arith.constant 0.000000e+00 : f32
    %21 = vector.broadcast %cst_13 : f32 to vector<128x1xf32>
    %22 = arith.cmpf ogt, %6, %21 : vector<128x1xf32>
    %cst_14 = arith.constant 1.000000e+00 : f32
    %cst_15 = arith.constant 0.000000e+00 : f32
    %23 = vector.broadcast %cst_14 : f32 to vector<128x1xf32>
    %24 = vector.broadcast %cst_15 : f32 to vector<128x1xf32>
    %25 = arith.select %22, %23, %24 : vector<128x1xi1>, vector<128x1xf32>
    %26 = vector.shape_cast %25 : vector<128x1xf32> to vector<1x128x1xf32>
    %cst_16 = arith.constant dense<0.000000e+00> : vector<1xf32>
    %27 = vector.multi_reduction <add>, %26, %cst_16 [1, 2] : vector<1x128x1xf32> to vector<1xf32>
    %28 = vector.shape_cast %27 : vector<1xf32> to vector<1x1x1xf32>
    %29 = vector.extract %28[0, 0, 0] : f32 from vector<1x1x1xf32>
    %30 = vector.shape_cast %6 : vector<128x1xf32> to vector<1x128x1xf32>
    %cst_17 = arith.constant dense<0xFF800000> : vector<1xf32>
    %31 = vector.multi_reduction <maximumf>, %30, %cst_17 [1, 2] : vector<1x128x1xf32> to vector<1xf32>
    %32 = vector.shape_cast %31 : vector<1xf32> to vector<1x1x1xf32>
    %33 = vector.extract %32[0, 0, 0] : f32 from vector<1x1x1xf32>
    %cst_18 = arith.constant 0.000000e+00 : f32
    %34 = vector.broadcast %cst_18 : f32 to vector<128x1xf32>
    %35 = arith.cmpf ogt, %6, %34 : vector<128x1xf32>
    %cst_19 = arith.constant 1.000000e+09 : f32
    %36 = vector.broadcast %cst_19 : f32 to vector<128x1xf32>
    %37 = arith.select %35, %6, %36 : vector<128x1xi1>, vector<128x1xf32>
    %38 = vector.shape_cast %37 : vector<128x1xf32> to vector<1x128x1xf32>
    %cst_20 = arith.constant dense<0x7F800000> : vector<1xf32>
    %39 = vector.multi_reduction <minimumf>, %38, %cst_20 [1, 2] : vector<1x128x1xf32> to vector<1xf32>
    %40 = vector.shape_cast %39 : vector<1xf32> to vector<1x1x1xf32>
    %41 = vector.extract %40[0, 0, 0] : f32 from vector<1x1x1xf32>
    %42 = tpu.iota {dimensions = array<i32: 1>} : vector<1x128xi32>
    %c0_i32_21 = arith.constant 0 : i32
    %43 = vector.broadcast %c0_i32_21 : i32 to vector<1x128xi32>
    %44 = arith.cmpi eq, %42, %43 : vector<1x128xi32>
    %45 = arith.extui %44 : vector<1x128xi1> to vector<1x128xi32>
    %46 = arith.sitofp %45 : vector<1x128xi32> to vector<1x128xf32>
    %47 = vector.broadcast %29 : f32 to vector<1x128xf32>
    %48 = arith.mulf %47, %46 : vector<1x128xf32>
    %c1_i32_22 = arith.constant 1 : i32
    %49 = vector.broadcast %c1_i32_22 : i32 to vector<1x128xi32>
    %50 = arith.cmpi eq, %42, %49 : vector<1x128xi32>
    %51 = arith.extui %50 : vector<1x128xi1> to vector<1x128xi32>
    %52 = arith.sitofp %51 : vector<1x128xi32> to vector<1x128xf32>
    %53 = vector.broadcast %33 : f32 to vector<1x128xf32>
    %54 = arith.mulf %53, %52 : vector<1x128xf32>
    %55 = arith.addf %48, %54 : vector<1x128xf32>
    %c2_i32 = arith.constant 2 : i32
    %56 = vector.broadcast %c2_i32 : i32 to vector<1x128xi32>
    %57 = arith.cmpi eq, %42, %56 : vector<1x128xi32>
    %58 = arith.extui %57 : vector<1x128xi1> to vector<1x128xi32>
    %59 = arith.sitofp %58 : vector<1x128xi32> to vector<1x128xf32>
    %60 = vector.broadcast %41 : f32 to vector<1x128xf32>
    %61 = arith.mulf %60, %59 : vector<1x128xf32>
    %62 = arith.addf %55, %61 : vector<1x128xf32>
    %c0_23 = arith.constant 0 : index
    %c0_24 = arith.constant 0 : index
    %63 = vector.load %arg4[%c0_23, %c0_24] : memref<1x128xf32, #tpu.memory_space<vmem>>, vector<1x128xf32>
    tpu.vector_store %arg4[%c0_23, %c0_24], %62 {strides = array<i32>} : memref<1x128xf32, #tpu.memory_space<vmem>>, vector<1x128xf32>,
    return
  }
  func.func @transform_0(%arg0: i32) -> (i32, i32) {
    %c0_i32 = arith.constant 0 : i32
    %c0_i32_0 = arith.constant 0 : i32
    %c0_i32_1 = arith.constant 0 : i32
    return %c0_i32, %c0_i32_0 : i32, i32
  }
  func.func @transform_1(%arg0: i32) -> (i32, i32) {
    %c0_i32 = arith.constant 0 : i32
    %c0_i32_0 = arith.constant 0 : i32
    %c0_i32_1 = arith.constant 0 : i32
    return %c0_i32, %c0_i32_0 : i32, i32
  }
  func.func @transform_2(%arg0: i32) -> (i32, i32) {
    %c0_i32 = arith.constant 0 : i32
    %c0_i32_0 = arith.constant 0 : i32
    %c0_i32_1 = arith.constant 0 : i32
    return %c0_i32, %c0_i32_0 : i32, i32
  }
  func.func @transform_3(%arg0: i32) -> (i32, i32) {
    %c0_i32 = arith.constant 0 : i32
    %c0_i32_0 = arith.constant 0 : i32
    %c0_i32_1 = arith.constant 0 : i32
    return %c0_i32, %c0_i32_0 : i32, i32
  }
}

</mosaic_0001>

<bundles_post_ra>
// kernel: tpu_custom_call.1
= control target key start
LH: loop header
LB: loop body
LE: loop exit
PB: predicated region body
PF: predicated region fallthrough
CT: control target
= control target key end

     0   :  { %9 = vsyncpa [#allocation3], 0  ;;  %v14_v0 = vlaneseq  ;;  %v1320_v2 = vmov 0.0   ;;  %s1322_s12 = smov 0   ;;  %s1888_s0 = inlined_call_operand.vmem [shape: f32[128,128], index: 0, kind: input, shape index: {}]   ;;  %s1889_s1 = inlined_call_operand.vmem [shape: f32[128,32], index: 1, kind: input, shape index: {}]   ;;  %s1890_s2 = inlined_call_operand.vmem [shape: f32[128,32], index: 2, kind: output, shape index: {0}]   ;;  %s1891_s3 = inlined_call_operand.hbm [shape: f32[1,128], index: 3, kind: output, shape index: {1}]  }
   0x2   :  { %v1318_v1 = vand.u32 127, %v14_v0 }
   0x3 LB: > { %s1329_s13 = sshll.u32 %s1292_s12, 3  ;;  %vm30_vm1 = vcmp.lt.f32.partialorder %v1288_v2, 0.5  ;;  %vm36_vm7 = vcmask 1040384   ;;  %v1294_v5 = vmov 0.0   ;;  %v1295_v20 = vmov 0   ;;  %s21_s12 = sadd.s32 1, %s1292_s12   ;;  %s1292_s12 = sphi %s1322_s12, %s21_s12   ;;  %v1288_v2 = vphi %v1320_v2, %v259_v2  }
   0x4   : > { %s1335_s16 = scalar_lea.vmem %s1888_s0, %s1329_s13  ;;  %v26_v3 = vstv %s1329_s13  ;;  %s50_s17 = sadd.s32 1, %s1329_s13  ;;  %vm63_vm15 = vcmask 1041409  }
   0x5   : > { %v1339_v4 = vld [vmem:[%s1335_s16] sm:$0xff]  ;;  %vm27_vm0 = vcmp.eq.s32.totalorder %v1318_v1, %v26_v3  ;;  %vm32_vm3 = vcmp.ge.s32.totalorder %v1318_v1, %v26_v3  ;;  %v51_v18 = vstv %s50_s17  ;;  %s80_s20 = sadd.s32 2, %s1329_s13  ;;  %s110_s22 = sadd.s32 3, %s1329_s13 }
   0x6   : > { %vm28_vm2 = vcmp.ge.f32.partialorder %v1339_v4, 0.5  ;;  %vm52_vm8 = vcmp.eq.s32.totalorder %v1318_v1, %v51_v18  ;;  %vm59_vm11 = vcmp.ge.s32.totalorder %v1318_v1, %v51_v18  ;;  %v81_v36 = vstv %s80_s20  ;;  %s140_s24 = sadd.s32 4, %s1329_s13  ;;  %s170_s26 = sadd.s32 5, %s1329_s13 }
   0x7   : > { %vm29_vm4 = vmor %vm28_vm2, %vm27_vm0  ;;  %v111_v55 = vstv %s110_s22  ;;  %s200_s28 = sadd.s32 6, %s1329_s13  ;;  %s230_s30 = sadd.s32 7, %s1329_s13 }
   0x8   : > { %vm31_vm5 = vmand %vm29_vm4, %vm30_vm1  ;;  %vm89_vm4 = vcmp.ge.s32.totalorder %v1318_v1, %v81_v36  ;;  %p18_p0 = scmp.ge.s32.totalorder %s21_s12, 16  }
   0x9   : > { %vm33_vm6 = vmand %vm31_vm5, %vm32_vm3 }
   0xa   : > { %v34_v6 = vsel %vm33_vm6, 1.0, %v1294_v5  ;;  %vm53_vm10 = vmor %vm28_vm2, %vm52_vm8 }
   0xb   : > { %v35_v7 = vsel %vm27_vm0, %v34_v6, 0.0  ;;  %vm82_vm0 = vcmp.eq.s32.totalorder %v1318_v1, %v81_v36 }
   0xc   : > { %v37_v8 = vsel %vm36_vm7, %v35_v7, -inf  ;;  %vm83_vm3 = vmor %vm28_vm2, %vm82_vm0 }
   0xd   : > { %38 = vmax.xlane.f32.xlu0 %v37_v8 }
  0x9a   : > { %v39_v9 = vpop.xlane.xlu0 %38 }
  0x9b   : > { %v40_v10 = vrot.slane %v39_v9, 4 }
  0x9d   : > { %v41_v11 = vmax.f32 %v39_v9, %v40_v10 }
  0x9f   : > { %v42_v12 = vrot.slane %v41_v11, 2 }
  0xa1   : > { %v43_v13 = vmax.f32 %v41_v11, %v42_v12  ;;  %v141_v12 = vstv %s140_s24 }
  0xa3   : > { %v44_v14 = vrot.slane %v43_v13, 1 }
  0xa5   : > { %v45_v15 = vmax.f32 %v43_v13, %v44_v14 }
  0xa7   : > { %1180 = vpush %v45_v15 }
  0xd8   : > { %s1181_s18 = spop %1180 }
  0xd9   : > { %v47_v16 = vstv %s1181_s18 }
  0xda   : > { %v48_v17 = vmul.f32 %v47_v16, %v34_v6 }
  0xdc   : > { %v49_v19 = vmax.f32 %v1288_v2, %v48_v17 }
  0xde   : > { %vm54_vm9 = vcmp.lt.f32.partialorder %v49_v19, 0.5 }
  0xdf   : > { %v55_v21 = vsel %vm54_vm9, 1, %v1295_v20  ;;  %vm93_vm9 = vcmask 1042434  }
  0xe0   : > { %v56_v22 = vrot.slane %v55_v21, 7 }
  0xe2   : > { %vm57_vm12 = vcmp.ne.s32.totalorder %v56_v22, 0 }
  0xe3   : > { %vm58_vm13 = vmand %vm53_vm10, %vm57_vm12  ;;  %vm261_vm10 = vcmask 1041408  }
  0xe4   : > { %vm60_vm14 = vmand %vm58_vm13, %vm59_vm11  ;;  %vm112_vm11 = vcmp.eq.s32.totalorder %v1318_v1, %v111_v55 }
  0xe5   : > { %v61_v23 = vsel %vm60_vm14, 1.0, %v1294_v5  ;;  %vm113_vm13 = vmor %vm28_vm2, %vm112_vm11  ;;  %vm119_vm14 = vcmp.ge.s32.totalorder %v1318_v1, %v111_v55 }
  0xe6   : > { %v62_v24 = vsel %vm52_vm8, %v61_v23, 0.0 }
  0xe7   : > { %v64_v25 = vsel %vm63_vm15, %v62_v24, -inf }
  0xe8   : > { %65 = vmax.xlane.f32.xlu0 %v64_v25 }
 0x175   : > { %v66_v26 = vpop.xlane.xlu0 %65 }
 0x176   : > { %v67_v27 = vrot.slane %v66_v26, 4 }
 0x178   : > { %v68_v28 = vmax.f32 %v66_v26, %v67_v27 }
 0x17a   : > { %v69_v29 = vrot.slane %v68_v28, 2 }
 0x17c   : > { %v70_v30 = vmax.f32 %v68_v28, %v69_v29 }
 0x17e   : > { %v71_v31 = vrot.slane %v70_v30, 1 }
 0x180   : > { %v72_v32 = vmax.f32 %v70_v30, %v71_v31  ;;  %v171_v31 = vstv %s170_s26 }
 0x182   : > { %1182 = vpush %v72_v32 }
 0x1b3   : > { %s1183_s19 = spop %1182 }
 0x1b4   : > { %v74_v33 = vstv %s1183_s19 }
 0x1b5   : > { %v75_v34 = vmul.f32 %v74_v33, %v61_v23 }
 0x1b7   : > { %v77_v35 = vrot.slane %v75_v34, 1  ;;  %v260_v52 = vsel %vm36_vm7, %v48_v17, %v75_v34  ;;  %vm263_vm7 = vcmask 1042432  }
 0x1b9   : > { %v79_v37 = vmax.f32 %v49_v19, %v77_v35 }
 0x1bb   : > { %vm84_vm1 = vcmp.lt.f32.partialorder %v79_v37, 0.5 }
 0x1bc   : > { %v85_v38 = vsel %vm84_vm1, 1, %v1295_v20 }
 0x1bd   : > { %v86_v39 = vrot.slane %v85_v38, 6 }
 0x1bf   : > { %vm87_vm5 = vcmp.ne.s32.totalorder %v86_v39, 0 }
 0x1c0   : > { %vm88_vm6 = vmand %vm83_vm3, %vm87_vm5  ;;  %vm123_vm3 = vcmask 1043459  }
 0x1c1   : > { %vm90_vm8 = vmand %vm88_vm6, %vm89_vm4  ;;  %vm142_vm4 = vcmp.eq.s32.totalorder %v1318_v1, %v141_v12 }
 0x1c2   : > { %v91_v40 = vsel %vm90_vm8, 1.0, %v1294_v5  ;;  %vm143_vm6 = vmor %vm28_vm2, %vm142_vm4  ;;  %vm149_vm8 = vcmp.ge.s32.totalorder %v1318_v1, %v141_v12 }
 0x1c3   : > { %v92_v41 = vsel %vm82_vm0, %v91_v40, 0.0 }
 0x1c4   : > { %v94_v42 = vsel %vm93_vm9, %v92_v41, -inf }
 0x1c5   : > { %95 = vmax.xlane.f32.xlu1 %v94_v42 }
 0x252   : > { %v96_v43 = vpop.xlane.xlu1 %95 }
 0x253   : > { %v97_v44 = vrot.slane %v96_v43, 4 }
 0x255   : > { %v98_v45 = vmax.f32 %v96_v43, %v97_v44 }
 0x257   : > { %v99_v46 = vrot.slane %v98_v45, 2 }
 0x259   : > { %v100_v47 = vmax.f32 %v98_v45, %v99_v46 }
 0x25b   : > { %v101_v48 = vrot.slane %v100_v47, 1 }
 0x25d   : > { %v102_v49 = vmax.f32 %v100_v47, %v101_v48 }
 0x25f   : > { %1184 = vpush %v102_v49  ;;  %v201_v49 = vstv %s200_s28 }
 0x290   : > { %s1185_s21 = spop %1184 }
 0x291   : > { %v104_v50 = vstv %s1185_s21 }
 0x292   : > { %v105_v51 = vmul.f32 %v104_v50, %v91_v40 }
 0x294   : > { %v107_v53 = vrot.slane %v105_v51, 2  ;;  %v262_v54 = vsel %vm261_vm10, %v260_v52, %v105_v51 }
 0x296   : > { %v109_v56 = vmax.f32 %v79_v37, %v107_v53 }
 0x298   : > { %vm114_vm12 = vcmp.lt.f32.partialorder %v109_v56, 0.5 }
 0x299   : > { %v115_v57 = vsel %vm114_vm12, 1, %v1295_v20  ;;  %vm153_vm12 = vcmask 1044484  }
 0x29a   : > { %v116_v58 = vrot.slane %v115_v57, 5 }
 0x29c   : > { %vm117_vm15 = vcmp.ne.s32.totalorder %v116_v58, 0 }
 0x29d   : > { %vm118_vm0 = vmand %vm113_vm13, %vm117_vm15  ;;  %vm265_vm13 = vcmask 1043456  }
 0x29e   : > { %vm120_vm1 = vmand %vm118_vm0, %vm119_vm14  ;;  %vm172_vm14 = vcmp.eq.s32.totalorder %v1318_v1, %v171_v31 }
 0x29f   : > { %v121_v59 = vsel %vm120_vm1, 1.0, %v1294_v5  ;;  %vm173_vm0 = vmor %vm28_vm2, %vm172_vm14  ;;  %vm179_vm1 = vcmp.ge.s32.totalorder %v1318_v1, %v171_v31 }
 0x2a0   : > { %v122_v60 = vsel %vm112_vm11, %v121_v59, 0.0 }
 0x2a1   : > { %v124_v61 = vsel %vm123_vm3, %v122_v60, -inf }
 0x2a2   : > { %125 = vmax.xlane.f32.xlu1 %v124_v61 }
 0x32f   : > { %v126_v62 = vpop.xlane.xlu1 %125 }
 0x330   : > { %v127_v63 = vrot.slane %v126_v62, 4 }
 0x332   : > { %v128_v0 = vmax.f32 %v126_v62, %v127_v63 }
 0x334   : > { %v129_v2 = vrot.slane %v128_v0, 2 }
 0x336   : > { %v130_v3 = vmax.f32 %v128_v0, %v129_v2 }
 0x338   : > { %v131_v6 = vrot.slane %v130_v3, 1 }
 0x33a   : > { %v132_v7 = vmax.f32 %v130_v3, %v131_v6  ;;  %v231_v6 = vstv %s230_s30 }
 0x33c   : > { %1186 = vpush %v132_v7 }
 0x36d   : > { %s1187_s23 = spop %1186 }
 0x36e   : > { %v134_v8 = vstv %s1187_s23 }
 0x36f   : > { %v135_v9 = vmul.f32 %v134_v8, %v121_v59 }
 0x371   : > { %v137_v10 = vrot.slane %v135_v9, 3  ;;  %v264_v11 = vsel %vm263_vm7, %v262_v54, %v135_v9 }
 0x373   : > { %v139_v13 = vmax.f32 %v109_v56, %v137_v10 }
 0x375   : > { %vm144_vm5 = vcmp.lt.f32.partialorder %v139_v13, 0.5 }
 0x376   : > { %v145_v14 = vsel %vm144_vm5, 1, %v1295_v20  ;;  %vm183_vm5 = vcmask 1045509  }
 0x377   : > { %v146_v15 = vrot.slane %v145_v14, 4 }
 0x379   : > { %vm147_vm9 = vcmp.ne.s32.totalorder %v146_v15, 0 }
 0x37a   : > { %vm148_vm10 = vmand %vm143_vm6, %vm147_vm9  ;;  %vm267_vm6 = vcmask 1044480  }
 0x37b   : > { %vm150_vm11 = vmand %vm148_vm10, %vm149_vm8  ;;  %vm202_vm8 = vcmp.eq.s32.totalorder %v1318_v1, %v201_v49 }
 0x37c   : > { %v151_v16 = vsel %vm150_vm11, 1.0, %v1294_v5  ;;  %vm203_vm10 = vmor %vm28_vm2, %vm202_vm8  ;;  %vm209_vm11 = vcmp.ge.s32.totalorder %v1318_v1, %v201_v49 }
 0x37d   : > { %v152_v17 = vsel %vm142_vm4, %v151_v16, 0.0 }
 0x37e   : > { %v154_v18 = vsel %vm153_vm12, %v152_v17, -inf }
 0x37f   : > { %155 = vmax.xlane.f32.xlu0 %v154_v18 }
 0x40c   : > { %v156_v19 = vpop.xlane.xlu0 %155 }
 0x40d   : > { %v157_v21 = vrot.slane %v156_v19, 4 }
 0x40f   : > { %v158_v22 = vmax.f32 %v156_v19, %v157_v21 }
 0x411   : > { %v159_v23 = vrot.slane %v158_v22, 2 }
 0x413   : > { %v160_v24 = vmax.f32 %v158_v22, %v159_v23  ;;  %v402_v23 = vld [vmem:[%s1889_s1] sm:$0xff] (%p18_p0) }
 0x415   : > { %v161_v25 = vrot.slane %v160_v24, 1 }
 0x417   : > { %v162_v26 = vmax.f32 %v160_v24, %v161_v25  ;;  %v403_v24 = vld [vmem:[%s1889_s1 + $0x8] sm:$0xff] (%p18_p0) }
 0x418   :  { %v1116_v25 = vpack.c.bf16 (%p18_p0), %v403_v24, %v402_v23 }
 0x419   : > { %1188 = vpush %v162_v26 }
 0x41a   :  { %1117 = vmatprep.subr.bf16.mxu0 (%p18_p0), %v1116_v25 }
 0x41b   :  { %1119 = vmatpush3.bf16.msra.mxu0 (%p18_p0), %v1116_v25 }
 0x44a   : > { %s1189_s25 = spop %1188 }
 0x44b   : > { %v164_v27 = vstv %s1189_s25 }
 0x44c   : > { %v165_v28 = vmul.f32 %v164_v27, %v151_v16  ;;  %v404_v27 = vld [vmem:[%s1889_s1 + $0x10] sm:$0xff] (%p18_p0) }
 0x44e   : > { %v167_v29 = vrot.slane %v165_v28, 4  ;;  %v266_v30 = vsel %vm265_vm13, %v264_v11, %v165_v28 }
 0x450   : > { %v169_v32 = vmax.f32 %v139_v13, %v167_v29  ;;  %v405_v29 = vld [vmem:[%s1889_s1 + $0x18] sm:$0xff] (%p18_p0) }
 0x451   :  { %v1120_v31 = vpack.c.bf16 (%p18_p0), %v405_v29, %v404_v27 }
 0x452   : > { %vm174_vm15 = vcmp.lt.f32.partialorder %v169_v32, 0.5 }
 0x453   : > { %v175_v33 = vsel %vm174_vm15, 1, %v1295_v20  ;;  %vm213_vm15 = vcmask 1046534   ;;  %1121 = vmatprep.subr.bf16.mxu0 (%p18_p0), %v1120_v31 }
 0x454   : > { %v176_v34 = vrot.slane %v175_v33, 3  ;;  %v407_v33 = vld [vmem:[%s1889_s1 + $0x28] sm:$0xff] (%p18_p0)  ;;  %1123 = vmatpush3.bf16.msra.mxu0 (%p18_p0), %v1120_v31 }
 0x456   : > { %vm177_vm3 = vcmp.ne.s32.totalorder %v176_v34, 0 }
 0x457   : > { %vm178_vm7 = vmand %vm173_vm0, %vm177_vm3  ;;  %vm269_vm0 = vcmask 1045504  }
 0x458   : > { %vm180_vm4 = vmand %vm178_vm7, %vm179_vm1  ;;  %vm232_vm1 = vcmp.eq.s32.totalorder %v1318_v1, %v231_v6 }
 0x459   : > { %v181_v35 = vsel %vm180_vm4, 1.0, %v1294_v5  ;;  %vm233_vm7 = vmor %vm28_vm2, %vm232_vm1  ;;  %vm239_vm4 = vcmp.ge.s32.totalorder %v1318_v1, %v231_v6  ;;  %vm271_vm2 = vcmask 1046528  }
 0x45a   : > { %v182_v36 = vsel %vm172_vm14, %v181_v35, 0.0 }
 0x45b   : > { %v184_v37 = vsel %vm183_vm5, %v182_v36, -inf  ;;  %v408_v36 = vld [vmem:[%s1889_s1 + $0x30] sm:$0xff] (%p18_p0) }
 0x45c   : > { %185 = vmax.xlane.f32.xlu1 %v184_v37  ;;  %v409_v37 = vld [vmem:[%s1889_s1 + $0x38] sm:$0xff] (%p18_p0) }
 0x4e9   : > { %v186_v38 = vpop.xlane.xlu1 %185 }
 0x4ea   : > { %v187_v39 = vrot.slane %v186_v38, 4 }
 0x4ec   : > { %v188_v40 = vmax.f32 %v186_v38, %v187_v39  ;;  %v1128_v39 = vpack.c.bf16 (%p18_p0), %v409_v37, %v408_v36 }
 0x4ee   : > { %v189_v41 = vrot.slane %v188_v40, 2 }
 0x4f0   : > { %v190_v42 = vmax.f32 %v188_v40, %v189_v41  ;;  %v410_v41 = vld [vmem:[%s1889_s1 + $0x40] sm:$0xff] (%p18_p0) }
 0x4f2   : > { %v191_v43 = vrot.slane %v190_v42, 1 }
 0x4f4   : > { %v192_v44 = vmax.f32 %v190_v42, %v191_v43  ;;  %v411_v42 = vld [vmem:[%s1889_s1 + $0x48] sm:$0xff] (%p18_p0) }
 0x4f6   : > { %1190 = vpush %v192_v44  ;;  %v1132_v44 = vpack.c.bf16 (%p18_p0), %v411_v42, %v410_v41 }
 0x527   : > { %s1191_s27 = spop %1190 }
 0x528   : > { %v194_v45 = vstv %s1191_s27 }
 0x529   : > { %v195_v46 = vmul.f32 %v194_v45, %v181_v35 }
 0x52b   : > { %v197_v47 = vrot.slane %v195_v46, 5  ;;  %v268_v48 = vsel %vm267_vm6, %v266_v30, %v195_v46  ;;  %v406_v30 = vld [vmem:[%s1889_s1 + $0x20] sm:$0xff] (%p18_p0)  ;;  %v412_v46 = vld [vmem:[%s1889_s1 + $0x50] sm:$0xff] (%p18_p0) }
 0x52c   :  { %v1124_v34 = vpack.c.bf16 (%p18_p0), %v407_v33, %v406_v30 }
 0x52d   : > { %v199_v50 = vmax.f32 %v169_v32, %v197_v47  ;;  %v413_v47 = vld [vmem:[%s1889_s1 + $0x58] sm:$0xff] (%p18_p0) }
 0x52e   :  { %1125 = vmatprep.subr.bf16.mxu0 (%p18_p0), %v1124_v34  ;;  %v1136_v49 = vpack.c.bf16 (%p18_p0), %v413_v47, %v412_v46 }
 0x52f   : > { %vm204_vm9 = vcmp.lt.f32.partialorder %v199_v50, 0.5  ;;  %1127 = vmatpush3.bf16.msra.mxu0 (%p18_p0), %v1124_v34 }
 0x530   : > { %v205_v51 = vsel %vm204_vm9, 1, %v1295_v20  ;;  %vm243_vm9 = vcmask 1047559   ;;  %1129 = vmatprep.subr.bf16.mxu0 (%p18_p0), %v1128_v39 }
 0x531   : > { %v206_v52 = vrot.slane %v205_v51, 2  ;;  %v414_v51 = vld [vmem:[%s1889_s1 + $0x60] sm:$0xff] (%p18_p0) }
 0x533   : > { %vm207_vm12 = vcmp.ne.s32.totalorder %v206_v52, 0  ;;  %1131 = vmatpush3.bf16.msra.mxu0 (%p18_p0), %v1128_v39  ;;  %v415_v52 = vld [vmem:[%s1889_s1 + $0x68] sm:$0xff] (%p18_p0) }
 0x534   : > { %vm208_vm13 = vmand %vm203_vm10, %vm207_vm12  ;;  %1133 = vmatprep.subr.bf16.mxu0 (%p18_p0), %v1132_v44  ;;  %vm789_vm10 = vcmask (%p18_p0), 7168  }
 0x535   : > { %vm210_vm14 = vmand %vm208_vm13, %vm209_vm11 }
 0x536   : > { %v211_v53 = vsel %vm210_vm14, 1.0, %v1294_v5 }
 0x537   : > { %v212_v54 = vsel %vm202_vm8, %v211_v53, 0.0  ;;  %1135 = vmatpush3.bf16.msra.mxu0 (%p18_p0), %v1132_v44 }
 0x538   : > { %v214_v55 = vsel %vm213_vm15, %v212_v54, -inf  ;;  %1137 = vmatprep.subr.bf16.mxu0 (%p18_p0), %v1136_v49  ;;  %v1140_v54 = vpack.c.bf16 (%p18_p0), %v415_v52, %v414_v51 }
 0x539   : > { %215 = vmax.xlane.f32.xlu0 %v214_v55 }
 0x53b   :  { %1139 = vmatpush3.bf16.msra.mxu0 (%p18_p0), %v1136_v49 }
 0x53c   :  { %1141 = vmatprep.subr.bf16.mxu0 (%p18_p0), %v1140_v54 }
 0x53f   :  { %1143 = vmatpush3.bf16.msra.mxu0 (%p18_p0), %v1140_v54 }
 0x5c6   : > { %v216_v56 = vpop.xlane.xlu0 %215 }
 0x5c7   : > { %v217_v57 = vrot.slane %v216_v56, 4 }
 0x5c9   : > { %v218_v58 = vmax.f32 %v216_v56, %v217_v57  ;;  %v416_v56 = vld [vmem:[%s1889_s1 + $0x70] sm:$0xff] (%p18_p0)  ;;  %v417_v57 = vld [vmem:[%s1889_s1 + $0x78] sm:$0xff] (%p18_p0) }
 0x5cb   : > { %v219_v59 = vrot.slane %v218_v58, 2 }
 0x5cd   : > { %v220_v60 = vmax.f32 %v218_v58, %v219_v59  ;;  %v1144_v59 = vpack.c.bf16 (%p18_p0), %v417_v57, %v416_v56 }
 0x5cf   : > { %v221_v61 = vrot.slane %v220_v60, 1  ;;  %1145 = vmatprep.subr.bf16.mxu0 (%p18_p0), %v1144_v59 }
 0x5d0   :  { %1147 = vmatpush3.bf16.msra.mxu0 (%p18_p0), %v1144_v59 }
 0x5d1   : > { %v222_v62 = vmax.f32 %v220_v60, %v221_v61 }
 0x5d3   : > { %1192 = vpush %v222_v62 }
 0x604   : > { %s1193_s29 = spop %1192 }
 0x605   : > { %v224_v63 = vstv %s1193_s29 }
 0x606   : > { %v225_v0 = vmul.f32 %v224_v63, %v211_v53 }
 0x608   : > { %v227_v2 = vrot.slane %v225_v0, 6  ;;  %v270_v3 = vsel %vm269_vm0, %v268_v48, %v225_v0 }
 0x60a   : > { %v229_v7 = vmax.f32 %v199_v50, %v227_v2 }
 0x60c   : > { %vm234_vm3 = vcmp.lt.f32.partialorder %v229_v7, 0.5 }
 0x60d   : > { %v235_v8 = vsel %vm234_vm3, 1, %v1295_v20 }
 0x60e   : > { %v236_v9 = vrot.slane %v235_v8, 1 }
 0x610   : > { %vm237_vm5 = vcmp.ne.s32.totalorder %v236_v9, 0 }
 0x611   : > { %vm238_vm6 = vmand %vm233_vm7, %vm237_vm5 }
 0x612   : > { %vm240_vm8 = vmand %vm238_vm6, %vm239_vm4 }
 0x613   : > { %v241_v10 = vsel %vm240_vm8, 1.0, %v1294_v5 }
 0x614   : > { %v242_v11 = vsel %vm232_vm1, %v241_v10, 0.0 }
 0x615   : > { %v244_v12 = vsel %vm243_vm9, %v242_v11, -inf }
 0x616   : > { %245 = vmax.xlane.f32.xlu1 %v244_v12 }
 0x6a3   : > { %v246_v13 = vpop.xlane.xlu1 %245 }
 0x6a4   : > { %v247_v14 = vrot.slane %v246_v13, 4 }
 0x6a6   : > { %v248_v15 = vmax.f32 %v246_v13, %v247_v14 }
 0x6a8   : > { %v249_v20 = vrot.slane %v248_v15, 2 }
 0x6aa   : > { %v250_v16 = vmax.f32 %v248_v15, %v249_v20 }
 0x6ac   : > { %v251_v4 = vrot.slane %v250_v16, 1 }
 0x6ae   : > { %v252_v17 = vmax.f32 %v250_v16, %v251_v4 }
 0x6b0   : > { %1194 = vpush %v252_v17 }
 0x6e1   : > { %s1195_s4 = spop %1194  ;;  %20 = sbr.rel (!%p18_p0) target bundleno = 3 (0x3), region = 44 }
 0x6e2   : > { %v254_v18 = vstv %s1195_s4 }
 0x6e3   : > { %v255_v19 = vmul.f32 %v254_v18, %v241_v10 }
 0x6e5   : > { %v257_v21 = vrot.slane %v255_v19, 7  ;;  %v272_v22 = vsel %vm271_vm2, %v270_v3, %v255_v19 }
 0x6e6   : > { %273 = vst [vmem:[%s1335_s16] sm:$0xff] %v272_v22  ;;  %s1297_s16 = smov (%p18_p0), [#allocation2]  }
 0x6e7   : > { %v259_v2 = vmax.f32 %v229_v7, %v257_v21   ;;  %s916_s17 = sshll.u32 (%p18_p0), %s1297_s16, 4  ;;  %s917_s17 = int_to_ptr.vmem [resolvable:$true] %s916_s17 }
 0x6e8   :  { %v1296_v2 = vmov 0.0   ;;  %s1254_s18 = scalar_lea.vmem %s917_s17, 16  ;;  %s1258_s19 = scalar_lea.vmem %s917_s17, 32 }
 0x6e9   :  { %p1255_p1 = scmp.ne.s32.totalorder %s917_s17, %s1254_s18  ;;  %p1259_p2 = scmp.lt.s32.totalorder %s917_s17, %s917_s17 }
 0x6ea   :  { %p1260_p3 = scmp.lt.s32.totalorder %s1258_s19, %s1254_s18 }
 0x6ec   :  { %p1261_p4 = por %p1260_p3, %p1259_p2 }
 0x6ed   :  { %v1407_v5 = vld [vmem:[%s1888_s0] sm:$0xff]  ;;  %v1419_v26 = vld [vmem:[%s1888_s0 + $0x10] sm:$0xff]  ;;  %v1429_v28 = vld [vmem:[%s1888_s0 + $0x8] sm:$0xff] }
 0x6ee   :  { %290 = vadd.xlane.f32.xlu0 %v1407_v5  ;;  %1036 = vmatprep.mubr.f32.mxu0 %v1407_v5  ;;  %v1440_v32 = vld [vmem:[%s1888_s0 + $0x18] sm:$0xff]  ;;  %v1450_v35 = vld [vmem:[%s1888_s0 + $0x20] sm:$0xff]  ;;  %v1461_v38 = vld [vmem:[%s1888_s0 + $0x28] sm:$0xff]  ;;  %p1262_p5 = pnand %p1261_p4, %p1255_p1 }
 0x6ef   :  { %294 = vadd.xlane.f32.xlu1 %v1419_v26  ;;  %v1468_v40 = vld [vmem:[%s1888_s0 + $0x30] sm:$0xff]  ;;  %v281_v43 = vld [vmem:[%s1888_s0 + $0x38] sm:$0xff]  ;;  %v282_v45 = vld [vmem:[%s1888_s0 + $0x40] sm:$0xff]  ;;  %1037 = vmatmul.mubr.f32.vlgmr.msra.gmra.mrb[0].mxu0 %v1429_v28 }
 0x6f0   :  { %v283_v48 = vld [vmem:[%s1888_s0 + $0x48] sm:$0xff]  ;;  %v284_v50 = vld [vmem:[%s1888_s0 + $0x50] sm:$0xff]  ;;  %v285_v53 = vld [vmem:[%s1888_s0 + $0x58] sm:$0xff]  ;;  %1039 = vmatprep.mubr.f32.mxu0 %v1419_v26 }
 0x6f1   :  { %v286_v55 = vld [vmem:[%s1888_s0 + $0x60] sm:$0xff]  ;;  %v287_v58 = vld [vmem:[%s1888_s0 + $0x68] sm:$0xff]  ;;  %v288_v60 = vld [vmem:[%s1888_s0 + $0x70] sm:$0xff] }
 0x6f2   :  { %292 = vadd.xlane.f32.xlu0 %v1429_v28  ;;  %v289_v61 = vld [vmem:[%s1888_s0 + $0x78] sm:$0xff] }
 0x6f3   :  { %296 = vadd.xlane.f32.xlu1 %v1440_v32  ;;  %1040 = vmatmul.mubr.f32.gmra.mrb[2].mxu0 %v1440_v32 }
 0x6f4   :  { %1042 = vmatprep.mubr.f32.mxu0 %v1450_v35 }
 0x6f6   :  { %298 = vadd.xlane.f32.xlu0 %v1450_v35 }
 0x6f7   :  { %300 = vadd.xlane.f32.xlu1 %v1461_v38  ;;  %1043 = vmatmul.mubr.f32.gmra.mrb[4].mxu0 %v1461_v38 }
 0x6f8   :  { %1045 = vmatprep.mubr.f32.mxu0 %v1468_v40 }
 0x6fa   :  { %302 = vadd.xlane.f32.xlu0 %v1468_v40 }
 0x6fb   :  { %304 = vadd.xlane.f32.xlu1 %v281_v43  ;;  %1046 = vmatmul.mubr.f32.gmra.mrb[6].mxu0 %v281_v43 }
 0x6fc   :  { %1048 = vmatprep.mubr.f32.mxu0 %v282_v45 }
 0x6fe   :  { %306 = vadd.xlane.f32.xlu0 %v282_v45 }
 0x6ff   :  { %308 = vadd.xlane.f32.xlu1 %v283_v48  ;;  %1049 = vmatmul.mubr.f32.gmra.mrb[8].mxu0 %v283_v48 }
 0x700   :  { %1051 = vmatprep.mubr.f32.mxu0 %v284_v50 }
 0x702   :  { %310 = vadd.xlane.f32.xlu0 %v284_v50 }
 0x703   :  { %312 = vadd.xlane.f32.xlu1 %v285_v53  ;;  %1052 = vmatmul.mubr.f32.gmra.mrb[10].mxu0 %v285_v53 }
 0x704   :  { %1054 = vmatprep.mubr.f32.mxu0 %v286_v55 }
 0x706   :  { %314 = vadd.xlane.f32.xlu0 %v286_v55 }
 0x707   :  { %316 = vadd.xlane.f32.xlu1 %v287_v58  ;;  %1055 = vmatmul.mubr.f32.gmra.mrb[12].mxu0 %v287_v58 }
 0x708   :  { %1057 = vmatprep.mubr.f32.mxu0 %v288_v60 }
 0x70a   :  { %318 = vadd.xlane.f32.xlu0 %v288_v60 }
 0x70b   :  { %320 = vadd.xlane.f32.xlu1 %v289_v61  ;;  %1058 = vmatmul.mubr.f32.gmra.mrb[14].mxu0 %v289_v61 }
 0x737   :  { %579 = vxpose.xlu0.b32.start [1/16] %v1407_v5, 128 }
 0x73b   :  { %580 = vxpose.xlu0.b32.cont [2/16] %v1429_v28, 128 }
 0x73f   :  { %581 = vxpose.xlu0.b32.cont [3/16] %v1419_v26, 128 }
 0x743   :  { %582 = vxpose.xlu0.b32.cont [4/16] %v1440_v32, 128 }
 0x747   :  { %583 = vxpose.xlu0.b32.cont [5/16] %v1450_v35, 128 }
 0x74b   :  { %584 = vxpose.xlu0.b32.cont [6/16] %v1461_v38, 128 }
 0x74f   :  { %585 = vxpose.xlu0.b32.cont [7/16] %v1468_v40, 128 }
 0x753   :  { %586 = vxpose.xlu0.b32.cont [8/16] %v281_v43, 128 }
 0x757   :  { %587 = vxpose.xlu0.b32.cont [9/16] %v282_v45, 128 }
 0x75b   :  { %588 = vxpose.xlu0.b32.cont [10/16] %v283_v48, 128 }
 0x75f   :  { %589 = vxpose.xlu0.b32.cont [11/16] %v284_v50, 128 }
 0x763   :  { %590 = vxpose.xlu0.b32.cont [12/16] %v285_v53, 128 }
 0x767   :  { %591 = vxpose.xlu0.b32.cont [13/16] %v286_v55, 128 }
 0x76b   :  { %592 = vxpose.xlu0.b32.cont [14/16] %v287_v58, 128 }
 0x76f   :  { %593 = vxpose.xlu0.b32.cont [15/16] %v288_v60, 128 }
 0x773   :  { %594 = vxpose.xlu0.b32.end [16/16] %v289_v61, 128 }
 0x77b   :  { %v1535_v62 = vpop.xlane.xlu0 %290 }
 0x77c   :  { %vm322_vm11 = vcmp.gt.f32.partialorder %v1535_v62, 0.0  ;;  %v338_v63 = vmax.f32 %v1535_v62, 1.0  ;;  %v1539_v0 = vpop.xlane.xlu1 %294 }
 0x77d   :  { %v773_v3 = vsel %vm322_vm11, 1.0, %v1296_v2  ;;  %v1547_v6 = vsel %vm322_vm11, %v1535_v62, 1e+09  ;;  %vm324_vm12 = vcmp.gt.f32.partialorder %v1539_v0, 0.0  ;;  %v340_v7 = vmax.f32 %v1539_v0, 1.0 }
 0x77e   :  { %v775_v8 = vsel %vm324_vm12, 1.0, %v1296_v2  ;;  %v1557_v9 = vsel %vm324_vm12, %v1539_v0, 1e+09  ;;  %1222 = vrcp.f32 %v338_v63  ;;  %v790_v11 = vsel %vm789_vm10, %v773_v3, 0.0 }
 0x77f   :  { %v1559_v10 = vpop.xlane.xlu0 %292  ;;  %1224 = vrcp.f32 %v340_v7  ;;  %v793_v14 = vsel %vm789_vm10, %v775_v8, 0.0 }
 0x780   :  { %vm323_vm13 = vcmp.gt.f32.partialorder %v1559_v10, 0.0  ;;  %v339_v12 = vmax.f32 %v1559_v10, 1.0  ;;  %v1564_v13 = vpop.xlane.xlu1 %296 }
 0x781   :  { %v774_v15 = vsel %vm323_vm13, 1.0, %v1296_v2  ;;  %v1573_v20 = vsel %vm323_vm13, %v1559_v10, 1e+09  ;;  %vm325_vm14 = vcmp.gt.f32.partialorder %v1564_v13, 0.0  ;;  %v341_v4 = vmax.f32 %v1564_v13, 1.0 }
 0x782   :  { %v791_v16 = vsel %vm789_vm10, %v774_v15, 0.0  ;;  %v776_v17 = vsel %vm325_vm14, 1.0, %v1296_v2  ;;  %v1584_v18 = vsel %vm325_vm14, %v1564_v13, 1e+09  ;;  %1226 = vrcp.f32 %v339_v12 }
 0x783   :  { %v792_v19 = vadd.f32 %v791_v16, %v790_v11  ;;  %v1586_v21 = vpop.xlane.xlu0 %298  ;;  %v795_v22 = vsel %vm789_vm10, %v776_v17, 0.0  ;;  %1228 = vrcp.f32 %v341_v4 }
 0x784   :  { %vm326_vm15 = vcmp.gt.f32.partialorder %v1586_v21, 0.0  ;;  %v342_v5 = vmax.f32 %v1586_v21, 1.0  ;;  %v830_v23 = vmax.f32 %v1535_v62, %v1586_v21  ;;  %v1593_v24 = vpop.xlane.xlu1 %300 }
 0x785   :  { %v794_v25 = vadd.f32 %v793_v14, %v792_v19  ;;  %v777_v26 = vsel %vm326_vm15, 1.0, %v1296_v2  ;;  %v856_v27 = vsel %vm326_vm15, %v1586_v21, 1e+09  ;;  %vm327_vm0 = vcmp.gt.f32.partialorder %v1593_v24, 0.0 }
 0x786   :  { %v797_v28 = vsel %vm789_vm10, %v777_v26, 0.0  ;;  %v868_v29 = vmin.f32 %v1547_v6, %v856_v27  ;;  %v343_v30 = vmax.f32 %v1593_v24, 1.0  ;;  %v778_v32 = vsel %vm327_vm0, 1.0, %v1296_v2 }
 0x787   :  { %v796_v31 = vadd.f32 %v795_v22, %v794_v25  ;;  %v831_v33 = vmax.f32 %v1559_v10, %v1593_v24  ;;  %v857_v34 = vsel %vm327_vm0, %v1593_v24, 1e+09  ;;  %v1613_v35 = vpop.xlane.xlu0 %302  ;;  %1230 = vrcp.f32 %v342_v5 }
 0x788   :  { %v799_v36 = vsel %vm789_vm10, %v778_v32, 0.0  ;;  %v869_v37 = vmin.f32 %v1573_v20, %v857_v34  ;;  %vm328_vm1 = vcmp.gt.f32.partialorder %v1613_v35, 0.0  ;;  %v1618_v38 = vpop.xlane.xlu1 %304  ;;  %v1620_v39 = vpop.eup %1222  ;;  %v344_v41 = vmax.f32 %v1613_v35, 1.0 }
 0x789   :  { %v798_v40 = vadd.f32 %v797_v28, %v796_v31  ;;  %v779_v42 = vsel %vm328_vm1, 1.0, %v1296_v2  ;;  %v832_v43 = vmax.f32 %v1539_v0, %v1613_v35  ;;  %v1628_v44 = vpop.eup %1224  ;;  %1232 = vrcp.f32 %v343_v30 }
 0x78a   :  { %v801_v45 = vsel %vm789_vm10, %v779_v42, 0.0  ;;  %v858_v46 = vsel %vm328_vm1, %v1613_v35, 1e+09  ;;  %vm329_vm3 = vcmp.gt.f32.partialorder %v1618_v38, 0.0  ;;  %v345_v49 = vmax.f32 %v1618_v38, 1.0 }
 0x78b   :  { %v800_v47 = vadd.f32 %v799_v36, %v798_v40  ;;  %v870_v48 = vmin.f32 %v1557_v9, %v858_v46  ;;  %v780_v50 = vsel %vm329_vm3, 1.0, %v1296_v2  ;;  %v1640_v51 = vpop.xlane.xlu0 %306  ;;  %1234 = vrcp.f32 %v344_v41 }
 0x78c   :  { %v803_v52 = vsel %vm789_vm10, %v780_v50, 0.0  ;;  %v833_v53 = vmax.f32 %v1564_v13, %v1618_v38  ;;  %v859_v54 = vsel %vm329_vm3, %v1618_v38, 1e+09  ;;  %v1648_v55 = vpop.xlane.xlu1 %308  ;;  %v1650_v56 = vpop.eup %1226  ;;  %vm330_vm7 = vcmp.gt.f32.partialorder %v1640_v51, 0.0 }
 0x78d   :  { %v802_v57 = vadd.f32 %v801_v45, %v800_v47  ;;  %v871_v58 = vmin.f32 %v1584_v18, %v859_v54  ;;  %v346_v59 = vmax.f32 %v1640_v51, 1.0  ;;  %v781_v60 = vsel %vm330_vm7, 1.0, %v1296_v2  ;;  %v1666_v9 = vpop.eup %1228 }
 0x78e   :  { %v834_v61 = vmax.f32 %v830_v23, %v1640_v51  ;;  %v860_v63 = vsel %vm330_vm7, %v1640_v51, 1e+09  ;;  %vm331_vm4 = vcmp.gt.f32.partialorder %v1648_v55, 0.0  ;;  %1236 = vrcp.f32 %v345_v49 }
 0x78f   :  { %v804_v3 = vadd.f32 %v803_v52, %v802_v57  ;;  %v805_v6 = vsel %vm789_vm10, %v781_v60, 0.0  ;;  %v872_v7 = vmin.f32 %v868_v29, %v860_v63  ;;  %v1664_v8 = vpop.xlane.xlu0 %310  ;;  %v347_v11 = vmax.f32 %v1648_v55, 1.0 }
 0x790   :  { %v782_v12 = vsel %vm331_vm4, 1.0, %v1296_v2  ;;  %v835_v14 = vmax.f32 %v831_v33, %v1648_v55  ;;  %v861_v15 = vsel %vm331_vm4, %v1648_v55, 1e+09  ;;  %v1676_v20 = vpop.xlane.xlu1 %312  ;;  %vm1892_vm5 = vcmp.gt.f32.partialorder %v1664_v8, 0.0 }
 0x791   :  { %v806_v16 = vadd.f32 %v805_v6, %v804_v3  ;;  %v807_v4 = vsel %vm789_vm10, %v782_v12, 0.0  ;;  %v873_v17 = vmin.f32 %v869_v37, %v861_v15  ;;  %v1680_v18 = vpop.eup %1230  ;;  %1238 = vrcp.f32 %v346_v59 }
 0x792   :  { %v348_v19 = vmax.f32 %v1664_v8, 1.0  ;;  %v783_v22 = vsel %vm1892_vm5, 1.0, %v1296_v2  ;;  %v836_v5 = vmax.f32 %v832_v43, %v1664_v8  ;;  %v862_v26 = vsel %vm1892_vm5, %v1664_v8, 1e+09 }
 0x793   :  { %v808_v23 = vadd.f32 %v807_v4, %v806_v16  ;;  %v809_v25 = vsel %vm789_vm10, %v783_v22, 0.0  ;;  %vm333_vm6 = vcmp.gt.f32.partialorder %v1676_v20, 0.0  ;;  %v1692_v27 = vpop.xlane.xlu0 %314  ;;  %v1233_v28 = vpop.eup %1232  ;;  %1240 = vrcp.f32 %v347_v11 }
 0x794   :  { %v874_v29 = vmin.f32 %v870_v48, %v862_v26  ;;  %v349_v30 = vmax.f32 %v1676_v20, 1.0  ;;  %v784_v31 = vsel %vm333_vm6, 1.0, %v1296_v2  ;;  %v1698_v32 = vpop.xlane.xlu1 %316  ;;  %1242 = vrcp.f32 %v348_v19 }
 0x795   :  { %v810_v33 = vadd.f32 %v809_v25, %v808_v23  ;;  %v837_v34 = vmax.f32 %v833_v53, %v1676_v20  ;;  %v863_v36 = vsel %vm333_vm6, %v1676_v20, 1e+09  ;;  %v1235_v37 = vpop.eup %1234  ;;  %vm334_vm8 = vcmp.gt.f32.partialorder %v1692_v27, 0.0 }
 0x796   :  { %1244 = vrcp.f32 %v349_v30  ;;  %v875_v40 = vmin.f32 %v871_v58, %v863_v36  ;;  %v350_v41 = vmax.f32 %v1692_v27, 1.0  ;;  %v811_v42 = vsel %vm789_vm10, %v784_v31, 0.0 }
 0x797   :  { %v838_v43 = vmax.f32 %v834_v61, %v1692_v27  ;;  %v864_v45 = vsel %vm334_vm8, %v1692_v27, 1e+09  ;;  %vm335_vm9 = vcmp.gt.f32.partialorder %v1698_v32, 0.0  ;;  %v319_v46 = vpop.xlane.xlu0 %318  ;;  %v351_v48 = vmax.f32 %v1698_v32, 1.0 }
 0x798   :  { %1246 = vrcp.f32 %v350_v41  ;;  %v876_v47 = vmin.f32 %v872_v7, %v864_v45  ;;  %v839_v49 = vmax.f32 %v835_v14, %v1698_v32  ;;  %v1714_v50 = vpop.xlane.xlu1 %320  ;;  %v1237_v52 = vpop.eup %1236  ;;  %v865_v53 = vsel %vm335_vm9, %v1698_v32, 1e+09 }
 0x799   :  { %vm336_vm2 = vcmp.gt.f32.partialorder %v319_v46, 0.0  ;;  %v352_v54 = vmax.f32 %v319_v46, 1.0  ;;  %v840_v57 = vmax.f32 %v836_v5, %v319_v46  ;;  %1248 = vrcp.f32 %v351_v48 }
 0x79a   :  { %v842_v58 = vmax.f32 %v838_v43, %v839_v49  ;;  %v877_v59 = vmin.f32 %v873_v17, %v865_v53  ;;  %v866_v60 = vsel %vm336_vm2, %v319_v46, 1e+09  ;;  %v785_v61 = vsel %vm334_vm8, 1.0, %v1296_v2 }
 0x79b   :  { %1250 = vrcp.f32 %v352_v54  ;;  %v878_v63 = vmin.f32 %v874_v29, %v866_v60  ;;  %vm337_vm5 = vcmp.gt.f32.partialorder %v1714_v50, 0.0  ;;  %v1239_v3 = vpop.eup %1238  ;;  %v841_v7 = vmax.f32 %v837_v34, %v1714_v50 }
 0x79c   :  { %v880_v6 = vmin.f32 %v876_v47, %v877_v59  ;;  %v867_v11 = vsel %vm337_vm5, %v1714_v50, 1e+09  ;;  %v786_v12 = vsel %vm335_vm9, 1.0, %v1296_v2  ;;  %v787_v15 = vsel %vm336_vm2, 1.0, %v1296_v2 }
 0x79d   :  { %v879_v14 = vmin.f32 %v875_v40, %v867_v11  ;;  %v788_v16 = vsel %vm337_vm5, 1.0, %v1296_v2  ;;  %v1241_v4 = vpop.eup %1240  ;;  %v843_v17 = vmax.f32 %v840_v57, %v841_v7  ;;  %v812_v19 = vadd.f32 %v811_v42, %v810_v33 }
 0x79e   :  { %v813_v22 = vsel %vm789_vm10, %v785_v61, 0.0  ;;  %v815_v5 = vsel %vm789_vm10, %v786_v12, 0.0  ;;  %v1243_v23 = vpop.eup %1242  ;;  %v817_v26 = vsel %vm789_vm10, %v787_v15, 0.0  ;;  %v819_v29 = vsel %vm789_vm10, %v788_v16, 0.0 }
 0x79f   :  { %v881_v25 = vmin.f32 %v878_v63, %v879_v14  ;;  %v387_v30 = vsel %vm323_vm13, %v1650_v56, 0.0  ;;  %v814_v34 = vadd.f32 %v813_v22, %v812_v19  ;;  %v386_v33 = vsel %vm322_vm11, %v1620_v39, 0.0 }
 0x7a0   :  { %v1245_v31 = vpop.eup %1244  ;;  %v389_v36 = vsel %vm325_vm14, %v1666_v9, 0.0  ;;  %v388_v40 = vsel %vm324_vm12, %v1628_v44, 0.0  ;;  %v391_v41 = vsel %vm327_vm0, %v1233_v28, 0.0  ;;  %v390_v10 = vsel %vm326_vm15, %v1680_v18, 0.0 }
 0x7a1   :  { %v393_v56 = vsel %vm329_vm3, %v1237_v52, 0.0  ;;  %v392_v62 = vsel %vm328_vm1, %v1235_v37, 0.0  ;;  %v816_v13 = vadd.f32 %v815_v5, %v814_v34  ;;  %v395_v9 = vsel %vm331_vm4, %v1241_v4, 0.0 }
 0x7a2   :  { %v1247_v39 = vpop.eup %1246  ;;  %v394_v0 = vsel %vm330_vm7, %v1239_v3, 0.0  ;;  %v397_v24 = vsel %vm333_vm6, %v1245_v31, 0.0  ;;  %vm1893_vm10 = vcmp.gt.f32.partialorder %v1664_v8, 0.0  ;;  %v1773_v35 = vmax.f32 %v842_v58, %v843_v17 }
 0x7a3   :  { %v396_v21 = vsel %vm1893_vm10, %v1243_v23, 0.0  ;;  %v1771_v38 = vsel %vm334_vm8, %v1247_v39, 0.0  ;;  %v1775_v44 = vmin.f32 %v880_v6, %v881_v25  ;;  %v1249_v18 = vpop.eup %1248  ;;  %v818_v55 = vadd.f32 %v817_v26, %v816_v13 }
 0x7a4   :  { %v399_v51 = vsel %vm335_vm9, %v1249_v18, 0.0  ;;  %v353_v7 = vmax.f32 %v1714_v50, 1.0  ;;  %vm890_vm11 = vcmp.eq.s32.totalorder %v1318_v1, 0  ;;  %vm895_vm12 = vcmp.eq.s32.totalorder %v1318_v1, 1 }
 0x7a5   :  { %v1251_v28 = vpop.eup %1250  ;;  %v820_v37 = vadd.f32 %v819_v29, %v818_v55  ;;  %vm901_vm13 = vcmp.eq.s32.totalorder %v1318_v1, 2 }
 0x7a6   :  { %v1780_v20 = vsel %vm336_vm2, %v1251_v28, 0.0  ;;  %1252 = vrcp.f32 %v353_v7  ;;  %v939_v7 = vsel %vm901_vm13, 1.0, %v1296_v2 }
 0x7a7   :  { %821 = vadd.xlane.f32.xlu1 %v820_v37 }
 0x7b7   :  { %v595_v8 = vpop.trf.xlu0 }
 0x7b8   :  { %1092 = vmatprep.mubr.f32.mxu1 %v595_v8  ;;  %v883_v8 = vrot.slane %v1775_v44, 4 }
 0x7bb   :  { %v1782_v27 = vpop.trf.xlu0 }
 0x7bf   :  { %v1784_v42 = vpop.trf.xlu0 }
 0x7c2   :  { %v1038_v47 = vpop.f32.mrb[0].mxu0 }
 0x7c3   :  { %v1786_v43 = vpop.trf.xlu0  ;;  %v564_v48 = vmul.f32 %v1038_v47, %v387_v30  ;;  %v484_v49 = vpop.f32.mrb[1].mxu0 }
 0x7c4   :  { %v563_v32 = vmul.f32 %v484_v49, %v386_v33 }
 0x7c6   :  { %v1041_v46 = vpop.f32.mrb[2].mxu0  ;;  %v1148_v53 = vpack.c.bf16 %v564_v48, %v563_v32 }
 0x7c7   :  { %v1788_v45 = vpop.trf.xlu0  ;;  %v566_v54 = vmul.f32 %v1041_v46, %v389_v36  ;;  %v494_v57 = vpop.f32.mrb[3].mxu0 }
 0x7c8   :  { %v565_v58 = vmul.f32 %v494_v57, %v388_v40  ;;  %1149 = vmatprep.subr.bf16.mxu1 %v1148_v53  ;;  %v1253_v40 = vpop.eup %1252 }
 0x7c9   :  { %1151 = vmatpush3.bf16.msra.mxu1 %v1148_v53  ;;  %v401_v13 = vsel %vm337_vm5, %v1253_v40, 0.0 }
 0x7ca   :  { %v1152_v59 = vpack.c.bf16 %v566_v54, %v565_v58  ;;  %v1044_v60 = vpop.f32.mrb[4].mxu0 }
 0x7cb   :  { %v1790_v52 = vpop.trf.xlu0  ;;  %v568_v61 = vmul.f32 %v1044_v60, %v391_v41  ;;  %v504_v63 = vpop.f32.mrb[5].mxu0 }
 0x7cc   :  { %v567_v6 = vmul.f32 %v504_v63, %v390_v10  ;;  %1153 = vmatprep.subr.bf16.mxu1 %v1152_v59 }
 0x7cd   :  { %1155 = vmatpush3.bf16.msra.mxu1 %v1152_v59 }
 0x7ce   :  { %v1156_v11 = vpack.c.bf16 %v568_v61, %v567_v6  ;;  %v1047_v12 = vpop.f32.mrb[6].mxu0 }
 0x7cf   :  { %v601_v3 = vpop.trf.xlu0  ;;  %v570_v14 = vmul.f32 %v1047_v12, %v393_v56  ;;  %v514_v15 = vpop.f32.mrb[7].mxu0 }
 0x7d0   :  { %v569_v16 = vmul.f32 %v514_v15, %v392_v62  ;;  %1157 = vmatprep.subr.bf16.mxu1 %v1156_v11 }
 0x7d1   :  { %1159 = vmatpush3.bf16.msra.mxu1 %v1156_v11 }
 0x7d2   :  { %v1160_v17 = vpack.c.bf16 %v570_v14, %v569_v16  ;;  %v1050_v19 = vpop.f32.mrb[8].mxu0 }
 0x7d3   :  { %v602_v4 = vpop.trf.xlu0  ;;  %v572_v22 = vmul.f32 %v1050_v19, %v395_v9  ;;  %v524_v5 = vpop.f32.mrb[9].mxu0 }
 0x7d4   :  { %v571_v23 = vmul.f32 %v524_v5, %v394_v0  ;;  %1161 = vmatprep.subr.bf16.mxu1 %v1160_v17 }
 0x7d5   :  { %1163 = vmatpush3.bf16.msra.mxu1 %v1160_v17 }
 0x7d6   :  { %v1164_v25 = vpack.c.bf16 %v572_v22, %v571_v23  ;;  %v1053_v26 = vpop.f32.mrb[10].mxu0 }
 0x7d7   :  { %v574_v29 = vmul.f32 %v1053_v26, %v397_v24  ;;  %v534_v30 = vpop.f32.mrb[11].mxu0  ;;  %v603_v31 = vpop.trf.xlu0 }
 0x7d8   :  { %v573_v34 = vmul.f32 %v534_v30, %v396_v21  ;;  %1165 = vmatprep.subr.bf16.mxu1 %v1164_v25 }
 0x7d9   :  { %1167 = vmatpush3.bf16.msra.mxu1 %v1164_v25 }
 0x7da   :  { %v1168_v33 = vpack.c.bf16 %v574_v29, %v573_v34  ;;  %v1056_v36 = vpop.f32.mrb[12].mxu0 }
 0x7db   :  { %v576_v41 = vmul.f32 %v1056_v36, %v399_v51  ;;  %v544_v10 = vpop.f32.mrb[13].mxu0  ;;  %v604_v62 = vpop.trf.xlu0 }
 0x7dc   :  { %v575_v56 = vmul.f32 %v544_v10, %v1771_v38  ;;  %1169 = vmatprep.subr.bf16.mxu1 %v1168_v33 }
 0x7dd   :  { %1171 = vmatpush3.bf16.msra.mxu1 %v1168_v33 }
 0x7de   :  { %v1172_v39 = vpack.c.bf16 %v576_v41, %v575_v56  ;;  %v1059_v9 = vpop.f32.mrb[14].mxu0 }
 0x7df   :  { %v578_v0 = vmul.f32 %v1059_v9, %v401_v13  ;;  %v554_v24 = vpop.f32.mrb[15].mxu0  ;;  %v605_v55 = vpop.trf.xlu0 }
 0x7e0   :  { %v577_v21 = vmul.f32 %v554_v24, %v1780_v20  ;;  %1173 = vmatprep.subr.bf16.mxu1 %v1172_v39  ;;  %v845_v20 = vrot.slane %v1773_v35, 4 }
 0x7e1   :  { %1175 = vmatpush3.bf16.msra.mxu1 %v1172_v39 }
 0x7e2   :  { %v1176_v18 = vpack.c.bf16 %v578_v0, %v577_v21 }
 0x7e3   :  { %v606_v38 = vpop.trf.xlu0 }
 0x7e4   :  { %1177 = vmatprep.subr.bf16.mxu1 %v1176_v18 }
 0x7e5   :  { %1179 = vmatpush3.bf16.msra.mxu1 %v1176_v18 }
 0x7e7   :  { %v607_v50 = vpop.trf.xlu0 }
 0x7e8   :  { %1093 = vmatmul.mubr.f32.vlgmr.msra.gmra.mrb[0].mxu1 %v1782_v27  ;;  %v846_v27 = vmax.f32 %v1773_v35, %v845_v20  ;;  %v937_v35 = vsel %vm890_vm11, 1.0, %v1296_v2 }
 0x7e9   :  { %1095 = vmatprep.mubr.f32.mxu1 %v1784_v42  ;;  %v884_v42 = vmin.f32 %v1775_v44, %v883_v8  ;;  %v938_v44 = vsel %vm895_vm12, 1.0, %v1296_v2 }
 0x7eb   :  { %v608_v28 = vpop.trf.xlu0  ;;  %v885_v48 = vrot.slane %v884_v42, 2 }
 0x7ec   :  { %1096 = vmatmul.mubr.f32.gmra.mrb[2].mxu1 %v1786_v43 }
 0x7ed   :  { %1098 = vmatprep.mubr.f32.mxu1 %v1788_v45  ;;  %v847_v45 = vrot.slane %v846_v27, 2  ;;  %v886_v46 = vmin.f32 %v884_v42, %v885_v48 }
 0x7ef   :  { %v609_v51 = vpop.trf.xlu0  ;;  %v848_v32 = vmax.f32 %v846_v27, %v847_v45  ;;  %v887_v58 = vrot.slane %v886_v46, 1 }
 0x7f0   :  { %1099 = vmatmul.mubr.f32.gmra.mrb[4].mxu1 %v1790_v52 }
 0x7f1   :  { %1101 = vmatprep.mubr.f32.mxu1 %v601_v3  ;;  %v849_v54 = vrot.slane %v848_v32, 1  ;;  %v888_v61 = vmin.f32 %v886_v46, %v887_v58 }
 0x7f3   :  { %v610_v37 = vpop.trf.xlu0  ;;  %v850_v60 = vmax.f32 %v848_v32, %v849_v54 }
 0x7f4   :  { %1102 = vmatmul.mubr.f32.gmra.mrb[6].mxu1 %v602_v4 }
 0x7f5   :  { %1104 = vmatprep.mubr.f32.mxu1 %v603_v31 }
 0x7f8   :  { %1105 = vmatmul.mubr.f32.gmra.mrb[8].mxu1 %v604_v62 }
 0x7f9   :  { %1107 = vmatprep.mubr.f32.mxu1 %v605_v55 }
 0x7fc   :  { %1108 = vmatmul.mubr.f32.gmra.mrb[10].mxu1 %v606_v38 }
 0x7fd   :  { %1110 = vmatprep.mubr.f32.mxu1 %v607_v50 }
 0x800   :  { %1111 = vmatmul.mubr.f32.gmra.mrb[12].mxu1 %v608_v28 }
 0x801   :  { %1113 = vmatprep.mubr.f32.mxu1 %v609_v51 }
 0x804   :  { %1114 = vmatmul.mubr.f32.gmra.mrb[14].mxu1 %v610_v37 }
 0x834   :  { %v822_v43 = vpop.xlane.xlu1 %821 }
 0x835   :  { %v823_v47 = vrot.slane %v822_v43, 4 }
 0x837   :  { %v824_v49 = vadd.f32 %v823_v47, %v822_v43 }
 0x839   :  { %v825_v52 = vrot.slane %v824_v49, 2 }
 0x83b   :  { %v826_v53 = vadd.f32 %v825_v52, %v824_v49 }
 0x83d   :  { %v827_v57 = vrot.slane %v826_v53, 1 }
 0x83f   :  { %v828_v59 = vadd.f32 %v827_v57, %v826_v53 }
 0x841   :  { %1196 = vpush %v828_v59 }
 0x842   :  { %1198 = vpush %v850_v60 }
 0x843   :  { %1200 = vpush %v888_v61 }
 0x872   :  { %s1197_s0 = spop %1196 }
 0x873   :  { %v893_v63 = vstv %s1197_s0  ;;  %s1199_s1 = spop %1198 }
 0x874   :  { %v894_v3 = vmul.f32 %v937_v35, %v893_v63  ;;  %v898_v6 = vstv %s1199_s1  ;;  %s1201_s15 = spop %1200 }
 0x875   :  { %v899_v11 = vmul.f32 %v938_v44, %v898_v6  ;;  %v904_v12 = vstv %s1201_s15 }
 0x876   :  { %v905_v14 = vmul.f32 %v939_v7, %v904_v12 }
 0x877   :  { %v900_v15 = vadd.f32 %v899_v11, %v894_v3 }
 0x879   :  { %v906_v16 = vadd.f32 %v905_v14, %v900_v15 }
 0x87b   :  { %907 = vst [vmem:[#allocation2] sm:$0x1] %v906_v16 }
 0x87c   :  { %1265 = shalt.err (!%p1262_p5)
}
 0x87d   :  { %s1266_s22 = scalar_lea.hbm %s1891_s3, 16 }
 0x87e   :  { %p1267_p6 = scmp.ne.s32.totalorder %s1891_s3, %s1266_s22  ;;  %p1270_p7 = scmp.lt.u32.totalorder %s1266_s22, %s1891_s3 }
 0x880   :  { %p1272_p8 = pnand %p1270_p7, %p1267_p6 }
 0x882   :  { %1275 = shalt.err (!%p1272_p8)
}
 0x883   :  { %919 = dma.vmem_to_hbm [thread:$0]  %s917_s17, 16, %s1891_s3, [#allocation3]   ;;  %vm756_vm14 = vcmask 261120  }
 0x8bb   :  { %v1094_v1 = vpop.f32.mrb[0].mxu1 }
 0x8bc   :  { %758 = vst.msk [vmem:[%s1890_s2 + $0x8] sm:$0xff] %vm756_vm14, %v1094_v1  ;;  %v677_v2 = vpop.f32.mrb[1].mxu1 }
 0x8bd   :  { %757 = vst.msk [vmem:[%s1890_s2] sm:$0xff] %vm756_vm14, %v677_v2 }
 0x8bf   :  { %v1097_v4 = vpop.f32.mrb[2].mxu1 }
 0x8c0   :  { %760 = vst.msk [vmem:[%s1890_s2 + $0x18] sm:$0xff] %vm756_vm14, %v1097_v4  ;;  %v687_v17 = vpop.f32.mrb[3].mxu1 }
 0x8c1   :  { %759 = vst.msk [vmem:[%s1890_s2 + $0x10] sm:$0xff] %vm756_vm14, %v687_v17 }
 0x8c3   :  { %v1100_v19 = vpop.f32.mrb[4].mxu1 }
 0x8c4   :  { %762 = vst.msk [vmem:[%s1890_s2 + $0x28] sm:$0xff] %vm756_vm14, %v1100_v19  ;;  %v697_v22 = vpop.f32.mrb[5].mxu1 }
 0x8c5   :  { %761 = vst.msk [vmem:[%s1890_s2 + $0x20] sm:$0xff] %vm756_vm14, %v697_v22 }
 0x8c7   :  { %v1103_v5 = vpop.f32.mrb[6].mxu1 }
 0x8c8   :  { %764 = vst.msk [vmem:[%s1890_s2 + $0x38] sm:$0xff] %vm756_vm14, %v1103_v5  ;;  %v707_v23 = vpop.f32.mrb[7].mxu1 }
 0x8c9   :  { %763 = vst.msk [vmem:[%s1890_s2 + $0x30] sm:$0xff] %vm756_vm14, %v707_v23 }
 0x8cb   :  { %v1106_v25 = vpop.f32.mrb[8].mxu1 }
 0x8cc   :  { %766 = vst.msk [vmem:[%s1890_s2 + $0x48] sm:$0xff] %vm756_vm14, %v1106_v25  ;;  %v717_v26 = vpop.f32.mrb[9].mxu1 }
 0x8cd   :  { %765 = vst.msk [vmem:[%s1890_s2 + $0x40] sm:$0xff] %vm756_vm14, %v717_v26 }
 0x8cf   :  { %v1109_v29 = vpop.f32.mrb[10].mxu1 }
 0x8d0   :  { %768 = vst.msk [vmem:[%s1890_s2 + $0x58] sm:$0xff] %vm756_vm14, %v1109_v29  ;;  %v727_v30 = vpop.f32.mrb[11].mxu1 }
 0x8d1   :  { %767 = vst.msk [vmem:[%s1890_s2 + $0x50] sm:$0xff] %vm756_vm14, %v727_v30 }
 0x8d3   :  { %v1112_v31 = vpop.f32.mrb[12].mxu1 }
 0x8d4   :  { %770 = vst.msk [vmem:[%s1890_s2 + $0x68] sm:$0xff] %vm756_vm14, %v1112_v31  ;;  %v737_v34 = vpop.f32.mrb[13].mxu1 }
 0x8d5   :  { %769 = vst.msk [vmem:[%s1890_s2 + $0x60] sm:$0xff] %vm756_vm14, %v737_v34 }
 0x8d7   :  { %v1115_v33 = vpop.f32.mrb[14].mxu1 }
 0x8d8   :  { %772 = vst.msk [vmem:[%s1890_s2 + $0x78] sm:$0xff] %vm756_vm14, %v1115_v33  ;;  %v747_v36 = vpop.f32.mrb[15].mxu1 }
 0x8d9   :  { %771 = vst.msk [vmem:[%s1890_s2 + $0x70] sm:$0xff] %vm756_vm14, %v747_v36 }
 0x8da   :  { %1284 = dma.done.wait [#allocation3], 16  }
 0x8db   :  { %1285 = vsyncadd [#allocation3], 4294967280 }
 0x8dc   :  { %925 = vsyncpa [#allocation3], 1 }

</bundles_post_ra>
